<compile_context>
chip_gen: v7x
topology: tpu7x:2x2x1
jax: 0.10.0
libtpu: 0.0.40
codegen_flags: <defaults>
</compile_context>

<pallas_src>
import numpy as np
import jax
import jax.numpy as jnp
from jax.experimental import pallas as pl
from jax.experimental.pallas import tpu as pltpu

C_LIGHT = 299792458.0


def bicubic_weight_matrix(in_size, out_size, A=-0.75):
    """Weight matrix replicating F.interpolate(..., mode='bicubic', align_corners=False)."""
    W = np.zeros((out_size, in_size), dtype=np.float64)
    scale = in_size / out_size
    for o in range(out_size):
        src = (o + 0.5) * scale - 0.5
        i0 = int(np.floor(src))
        t = src - i0
        w0 = ((A * (t + 1) - 5 * A) * (t + 1) + 8 * A) * (t + 1) - 4 * A
        w1 = ((A + 2) * t - (A + 3)) * t * t + 1
        w2 = ((A + 2) * (1 - t) - (A + 3)) * (1 - t) * (1 - t) + 1
        w3 = 1.0 - w0 - w1 - w2
        for k, w in enumerate((w0, w1, w2, w3)):
            idx = min(max(i0 - 1 + k, 0), in_size - 1)
            W[o, idx] += w
    return W.astype(np.float32)


# ----------------------------- Pallas kernel ---------------------------------

def _echo_matmul_kernel(x_ref, w_ref, y_ref):
    """One dense, lane-dense MXU matmul: (rows, Kpad) @ (Kpad, Npad) -> f32.

    x_ref : (rows, Kpad)  bf16, rows = padded [real | imag] flattened k-space planes
    w_ref : (Kpad, Npad)  bf16, fused block-complex (bicubic ⊗ phase) operator
    y_ref : (rows, Npad)  f32,  [real | imag] of interp * phase, flattened (Nz*Nx)
    """
    y_ref[...] = jnp.dot(x_ref[...], w_ref[...],
                         preferred_element_type=jnp.float32).astype(y_ref.dtype)


# ------------------------------- Model ---------------------------------------

class SarModelPallas:
    def __init__(self, f_start=30e9, f_stop=35e9, f_ds_rate=1, r0=0.58,
                 Nx=24, Nz=24, Nf=8, dx=0.005, dz=0.005,
                 nx_im=32, nz_im=32, ny_im=8, ds_rate=0.5, rnd_seed=0,
                 matmul_dtype=jnp.bfloat16, row_tile=128):
        c = C_LIGHT
        self.R0 = r0
        self.Nx, self.Nz, self.Nf = Nx, Nz, Nf
        self.nx_im, self.nz_im, self.ny_im = nx_im, nz_im, ny_im
        self.matmul_dtype = matmul_dtype
        self._row_tile = int(row_tile)

        self.k_now = 2 * np.pi * f_start / c

        # sampling mask (random_sampling_mask), deterministic via numpy seed
        if ds_rate == 1:
            mask2d = np.ones((Nz, Nx), dtype=np.float32)
        else:
            num_ds = int(ds_rate * Nz * Nx)
            ind = np.concatenate((np.ones(num_ds), np.zeros(int(Nz * Nx - num_ds))), axis=0)
            np.random.seed(rnd_seed)
            ind_rand = np.random.permutation(ind)
            mask2d = ind_rand.reshape(Nz, Nx).astype(np.float32)
        self.mask2d = jnp.asarray(mask2d)

        # k-space grids (matching __init__ of the torch module)
        len_x = (Nx - 1) * dx
        len_z = (Nz - 1) * dz
        kx_step = (2 * np.pi / dx - 2 * np.pi / len_x) / (Nx - 1)
        kz_step = (2 * np.pi / dz - 2 * np.pi / len_z) / (Nz - 1)
        dx_im = len_x / (nx_im - 1)
        dz_im = len_z / (nz_im - 1)
        kx_im_step = (2 * np.pi / dx_im - 2 * np.pi / len_x) / (nx_im - 1)
        kz_im_step = (2 * np.pi / dz_im - 2 * np.pi / len_z) / (nz_im - 1)

        kx2 = ((np.arange(Nx, dtype=np.float32) - (Nx - 1) / 2) * kx_step).astype(np.float32)
        kz2 = ((np.arange(Nz, dtype=np.float32) - (Nz - 1) / 2) * kz_step).astype(np.float32)
        kx_im = ((np.arange(nx_im, dtype=np.float32) - (nx_im - 1) / 2) * kx_im_step).astype(np.float32)
        kz_im = ((np.arange(nz_im, dtype=np.float32) - (nz_im - 1) / 2) * kz_im_step).astype(np.float32)

        ind_kz = np.nonzero((kz_im < (kz2 + kz_im_step).max()) &
                            (kz_im > (kz2 - kz_im_step).min()))[0]
        # NOTE: exclusive-end slicing (ind[0]:ind[-1]) reproduces the torch reference,
        # which slices with the 1-element tensors ind[0]/ind[-1] as python slice bounds.
        self.kz_s, self.kz_e = int(ind_kz[0]), int(ind_kz[-1])
        ind_kx = np.nonzero((kx_im < (kx2 + kx_im_step).max()) &
                            (kx_im > (kx2 - kx_im_step).min()))[0]
        self.kx_s, self.kx_e = int(ind_kx[0]), int(ind_kx[-1])
        self.Hs = self.kz_e - self.kz_s
        self.Ws = self.kx_e - self.kx_s

        # bicubic interpolation matrices (deterministic "parameters")
        self._wz_np = bicubic_weight_matrix(self.Hs, Nz)          # (Nz, Hs) f32
        self._wx_np = bicubic_weight_matrix(self.Ws, Nx)          # (Nx, Ws) f32
        self.Wz = jnp.asarray(self._wz_np)                        # f32 (reference path)
        self.WxT = jnp.asarray(self._wx_np.T)                     # (Ws, Nx) f32 (reference)

        # phase_mat for the 2-D path:
        # exp(-j * R0 * sqrt(4*k_now^2 - kz_mat^2 - kx_mat^2)), meshgrid indexing 'ij'
        kz_mat, kx_mat = np.meshgrid(kz2, kx2, indexing='ij')
        val = (4.0 * self.k_now ** 2
               - kz_mat.astype(np.complex64) ** 2
               - kx_mat.astype(np.complex64) ** 2).astype(np.complex64)
        phase = np.exp(-1j * r0 * np.sqrt(val)).astype(np.complex64)
        self.phase_r = jnp.asarray(phase.real.astype(np.float32))
        self.phase_i = jnp.asarray(phase.imag.astype(np.float32))

        # ---- fused block-complex operator: bicubic interp ⊗ complex phase ----
        # K[h*Ws+w, o*Nx+n] = Wz[o,h] * Wx[n,w]   (flattened (h,w) -> flattened (o,n))
        K = np.kron(self._wz_np.T, self._wx_np.T).astype(np.float32)     # (Hs*Ws, Nz*Nx)
        pr = phase.real.reshape(-1).astype(np.float32)                   # (Nz*Nx,)
        pi = phase.imag.reshape(-1).astype(np.float32)
        A_ = K * pr[None, :]
        B_ = K * pi[None, :]
        Wc = np.block([[A_, B_], [-B_, A_]]).astype(np.float32)          # (2*Hs*Ws, 2*Nz*Nx)
        self._Kc = 2 * self.Hs * self.Ws                                  # 1058
        self._Nc = 2 * Nz * Nx                                            # 1152
        self._Kc_pad = ((self._Kc + 127) // 128) * 128                    # 1152 (lane/tile aligned)
        self._Nc_pad = ((self._Nc + 127) // 128) * 128                    # 1152 (lane-dense stores)
        Wp = np.zeros((self._Kc_pad, self._Nc_pad), dtype=np.float32)
        Wp[:self._Kc, :self._Nc] = Wc
        self._W_mxu = jnp.asarray(Wp).astype(self.matmul_dtype)           # ~2.6 MB bf16

    # -------- Pallas wrapper --------
    def _echo_matmul_call(self, x):
        M, Kp = x.shape
        Np = self._Nc_pad
        vmem = pl.BlockSpec(memory_space=pltpu.MemorySpace.VMEM)
        if M <= self._row_tile:
            # Small batch: single gridless call, everything resident in VMEM.
            return pl.pallas_call(
                _echo_matmul_kernel,
                out_shape=jax.ShapeDtypeStruct((M, Np), jnp.float32),
                in_specs=[vmem, vmem],
                out_specs=vmem,
            )(x, self._W_mxu)
        # Large batch: shard rows over a "parallel" grid axis (v7x: 2 TensorCores).
        TM = self._row_tile
        return pl.pallas_call(
            _echo_matmul_kernel,
            out_shape=jax.ShapeDtypeStruct((M, Np), jnp.float32),
            grid_spec=pltpu.PrefetchScalarGridSpec(
                num_scalar_prefetch=0,
                grid=(M // TM,),
                in_specs=[pl.BlockSpec((TM, Kp), lambda i: (i, 0)),
                          pl.BlockSpec((Kp, Np), lambda i: (0, 0))],
                out_specs=pl.BlockSpec((TM, Np), lambda i: (i, 0))),
            compiler_params=pltpu.CompilerParams(
                dimension_semantics=("parallel",)),
        )(x, self._W_mxu)

    # -------- forward (2-D scene path) --------
    def forward(self, scene_real, scene_imag=None, complex_input=False):
        if complex_input:
            scene = scene_real
        else:
            scene = jax.lax.complex(scene_real.astype(jnp.float32),
                                    scene_imag.astype(jnp.float32))
        if scene.ndim != 4:
            # TODO(synk): 5-D (3-D scene) path (get_echo_for_3d_scene) not implemented.
            raise NotImplementedError("Only 2-D (B-C-H-W) scene is implemented.")
        B, Cc, H, W = scene.shape
        BC = B * Cc
        z = jnp.fft.fftshift(scene)        # all axes (matches torch default dim=None)
        z = jnp.fft.fft2(z)                # last two axes
        z = jnp.fft.fftshift(z)
        z = z[:, :, self.kz_s:self.kz_e, self.kx_s:self.kx_e]

        # Flatten each plane; stack [real | imag] along the lane (contraction) axis.
        hw = self.Hs * self.Ws
        xr = jnp.real(z).reshape(BC, hw)
        xi = jnp.imag(z).reshape(BC, hw)
        x = jnp.concatenate([xr, xi], axis=1)                       # (BC, 2*Hs*Ws)

        # Pad rows to >=8 (and to a multiple of the row tile for the grid path) and
        # pad the contraction dim to a multiple of 128 (lane/tile-aligned bf16 loads).
        rows = max(8, ((BC + 7) // 8) * 8)
        if rows > self._row_tile:
            rows = ((rows + self._row_tile - 1) // self._row_tile) * self._row_tile
        x = jnp.pad(x, ((0, rows - BC), (0, self._Kc_pad - self._Kc)))
        x = x.astype(self.matmul_dtype)

        y = self._echo_matmul_call(x)                               # (rows, Nc_pad) f32

        nzx = self.Nz * self.Nx
        yr = y[:BC, :nzx].reshape(B, Cc, self.Nz, self.Nx)
        yi = y[:BC, nzx:2 * nzx].reshape(B, Cc, self.Nz, self.Nx)
        z = jax.lax.complex(yr, yi)
        z = jnp.fft.ifftshift(z)
        z = jnp.fft.ifft2(z)
        z = jnp.fft.ifftshift(z)
        # Sampling-mask multiply in plain JAX: XLA fuses this tiny elementwise op into
        # the ifft epilogue; a dedicated pallas_call here is pure launch overhead.
        return z * self.mask2d

    # -------- pure-JAX f32 reference of the same math (for verification) --------
    def forward_ref(self, scene_real, scene_imag):
        scene = scene_real + 1j * scene_imag
        z = jnp.fft.fftshift(scene)
        z = jnp.fft.fft2(z)
        z = jnp.fft.fftshift(z)
        z = z[:, :, self.kz_s:self.kz_e, self.kx_s:self.kx_e]
        interp = jnp.einsum('oh,bchw,wn->bcon', self.Wz, z, self.WxT)
        phase = self.phase_r + 1j * self.phase_i
        z = interp * phase
        z = jnp.fft.ifftshift(z)
        z = jnp.fft.ifft2(z)
        z = jnp.fft.ifftshift(z)
        return z * self.mask2d


if __name__ == "__main__":
    model = SarModelPallas(Nx=24, Nz=24, Nf=8, nx_im=32, nz_im=32, ny_im=8,
                           ds_rate=0.5, rnd_seed=0)

    key = jax.random.PRNGKey(0)
    k1, k2, k3, k4 = jax.random.split(key, 4)

    # ---- small batch: exercises the gridless single-call path ----
    B, C, H, W = 2, 1, model.nz_im, model.nx_im          # (2, 1, 32, 32)
    scene_real = jax.random.normal(k1, (B, C, H, W), dtype=jnp.float32)
    scene_imag = jax.random.normal(k2, (B, C, H, W), dtype=jnp.float32)

    out = jax.block_until_ready(model.forward(scene_real, scene_imag))
    ref = jax.block_until_ready(model.forward_ref(scene_real, scene_imag))
    err = jnp.linalg.norm(out - ref) / (jnp.linalg.norm(ref) + 1e-12)
    assert out.shape == (B, C, model.Nz, model.Nx)
    # bf16 MXU inputs / fused bf16 operator with f32 accumulation: ~1e-3 relative error.
    assert float(err) < 2e-2, f"relative error too large (small batch): {float(err)}"

    # ---- larger batch: exercises the 1-D "parallel" row-grid path ----
    B2, C2 = 8, 32                                        # BC = 256 -> 2 grid steps of 128
    scene_real2 = jax.random.normal(k3, (B2, C2, H, W), dtype=jnp.float32)
    scene_imag2 = jax.random.normal(k4, (B2, C2, H, W), dtype=jnp.float32)
    out2 = jax.block_until_ready(model.forward(scene_real2, scene_imag2))
    ref2 = jax.block_until_ready(model.forward_ref(scene_real2, scene_imag2))
    err2 = jnp.linalg.norm(out2 - ref2) / (jnp.linalg.norm(ref2) + 1e-12)
    assert out2.shape == (B2, C2, model.Nz, model.Nx)
    assert float(err2) < 2e-2, f"relative error too large (large batch): {float(err2)}"

    print("KERNEL_OK")
</pallas_src>

<mosaic_0001>
module attributes {stable_mosaic.version = 11 : i64} {
  func.func @_echo_matmul_kernel(%arg0: memref<8x1152xbf16, #tpu.memory_space<vmem>>, %arg1: memref<1152x1152xbf16, #tpu.memory_space<vmem>>, %arg2: memref<8x1152xf32, #tpu.memory_space<vmem>>) attributes {dimension_semantics = [], scalar_prefetch = 0 : i64, scratch_operands = 0 : i64, tpu.core_type = #tpu.core_type<tc>} {
    %c0 = arith.constant 0 : index
    %c0_0 = arith.constant 0 : index
    %0 = vector.load %arg0[%c0, %c0_0] : memref<8x1152xbf16, #tpu.memory_space<vmem>>, vector<8x1152xbf16>
    %c0_1 = arith.constant 0 : index
    %c0_2 = arith.constant 0 : index
    %1 = vector.load %arg1[%c0_1, %c0_2] : memref<1152x1152xbf16, #tpu.memory_space<vmem>>, vector<1152x1152xbf16>
    %cst = arith.constant dense<0.000000e+00> : vector<8x1152xf32>
    %2 = tpu.matmul %0, %1, %cst {dimension_numbers = #tpu.dot_dimension_numbers<[1], [0], [0], [1], [0, 0, 1, 1], [], []>} : vector<8x1152xbf16>, vector<1152x1152xbf16>, vector<8x1152xf32> -> vector<8x1152xf32>
    %c0_3 = arith.constant 0 : index
    %c0_4 = arith.constant 0 : index
    %3 = vector.load %arg2[%c0_3, %c0_4] : memref<8x1152xf32, #tpu.memory_space<vmem>>, vector<8x1152xf32>
    tpu.vector_store %arg2[%c0_3, %c0_4], %2 {strides = array<i32>} : memref<8x1152xf32, #tpu.memory_space<vmem>>, vector<8x1152xf32>,
    return
  }
}

</mosaic_0001>

<bundles_post_ra>
// kernel: tpu_custom_call.1
= control target key start
LH: loop header
LB: loop body
LE: loop exit
PB: predicated region body
PF: predicated region fallthrough
CT: control target
= control target key end

     0   :  { %7 = vsyncpa [#allocation3], 0  ;;  %s7166_s0 = inlined_call_operand.hbm [shape: bf16[8,1152], index: 0, kind: input, shape index: {}]   ;;  %s7167_s1 = inlined_call_operand.hbm [shape: bf16[1152,1152], index: 1, kind: input, shape index: {}]   ;;  %s7168_s2 = inlined_call_operand.hbm [shape: f32[8,1152], index: 2, kind: output, shape index: {}]  }
   0x1   :  { %8 = vsyncpa [#allocation6], 0 }
   0x2   :  { %9 = vsyncpa [#allocation4], 0  ;;  %s7017_s9 = smov [#allocation2]   ;;  %s7018_s11 = smov [#allocation5]  }
   0x3   :  { %s16_s10 = sshll.u32 %s7017_s9, 4  ;;  %s25_s12 = sshll.u32 %s7018_s11, 4  ;;  %s17_s10 = int_to_ptr.vmem [resolvable:$true] %s16_s10  ;;  %s7040_s12 = int_to_ptr.vmem [resolvable:$true] %s25_s12 }
   0x4   :  { %s6945_s15 = scalar_lea.hbm %s7166_s0, 576 }
   0x5   :  { %p6946_p0 = scmp.ne.s32.totalorder %s7166_s0, %s6945_s15  ;;  %p6949_p1 = scmp.lt.u32.totalorder %s6945_s15, %s7166_s0 }
   0x7   :  { %p6951_p2 = pnand %p6949_p1, %p6946_p0 }
   0x9   :  { %6954 = shalt.err (!%p6951_p2)
}
   0xa   :  { %s6955_s20 = scalar_lea.vmem %s17_s10, 576  ;;  %p6960_p4 = scmp.lt.s32.totalorder %s17_s10, %s17_s10 }
   0xb   :  { %p6956_p3 = scmp.ne.s32.totalorder %s17_s10, %s6955_s20  ;;  %p6961_p5 = scmp.lt.s32.totalorder %s6955_s20, %s6955_s20 }
   0xd   :  { %p6962_p6 = por %p6961_p5, %p6960_p4 }
   0xf   :  { %p6963_p7 = pnand %p6962_p6, %p6956_p3 }
  0x11   :  { %6966 = shalt.err (!%p6963_p7)
}
  0x12   :  { %19 = dma.hbm_to_vmem [thread:$0]  %s7166_s0, 576, %s17_s10, [#allocation3]  }
  0x13   :  { %s6967_s25 = scalar_lea.hbm %s7167_s1, 82944 }
  0x14   :  { %p6968_p8 = scmp.ne.s32.totalorder %s7167_s1, %s6967_s25  ;;  %p6971_p9 = scmp.lt.u32.totalorder %s6967_s25, %s7167_s1 }
  0x16   :  { %p6973_p10 = pnand %p6971_p9, %p6968_p8 }
  0x18   :  { %6976 = shalt.err (!%p6973_p10)
}
  0x19   :  { %s6977_s30 = scalar_lea.vmem %s7040_s12, 82944  ;;  %p6982_p12 = scmp.lt.s32.totalorder %s7040_s12, %s7040_s12 }
  0x1a   :  { %p6978_p11 = scmp.ne.s32.totalorder %s7040_s12, %s6977_s30  ;;  %p6983_p13 = scmp.lt.s32.totalorder %s6977_s30, %s6977_s30 }
  0x1c   :  { %p6984_p0 = por %p6983_p13, %p6982_p12 }
  0x1e   :  { %p6985_p1 = pnand %p6984_p0, %p6978_p11 }
  0x20   :  { %6988 = shalt.err (!%p6985_p1)
}
  0x21   :  { %s7019_s0 = smov 576   ;;  %s7020_s3 = smov 36  }
  0x22   :  { %31 = dma.hbm_to_vmem [thread:$0]  %s7167_s1, 82944, %s7040_s12, [#allocation6], %s7019_s0, %s7019_s0, %s7020_s3  }
  0x23   :  { %7011 = dma.done.wait [#allocation3], 576  }
  0x24   :  { %7012 = vsyncadd [#allocation3], 4294966720 }
  0x25   :  { %7013 = dma.done.wait [#allocation6], 82944  }
  0x26   :  { %7014 = vsyncadd [#allocation6], 4294884352  ;;  %v5999_v0 = vld [vmem:[#allocation5 + $0x4] ss:$36 sps:$4 sm:$0xff]   ;;  %v6001_v1 = vld [vmem:[#allocation5 + $0xc] ss:$36 sps:$4 sm:$0xff]  }
  0x27   :  { %4108 = vmatprep.subr.bf16.mxu0 %v5999_v0  ;;  %v6003_v2 = vld [vmem:[#allocation5] ss:$36 sps:$4 sm:$0xff]   ;;  %v6004_v3 = vld [vmem:[#allocation5 + $0x8] ss:$36 sps:$4 sm:$0xff]   ;;  %4313 = vmatprep.subr.bf16.mxu1 %v6001_v1  ;;  %v6007_v5 = vld [vmem:[#allocation5 + $0x54] ss:$36 sps:$4 sm:$0xff]  }
  0x28   :  { %v6005_v4 = vld [vmem:[#allocation5 + $0x4c] ss:$36 sps:$4 sm:$0xff]   ;;  %4109 = vmatpush1.bf16.msra.mxu0 %v6003_v2  ;;  %4314 = vmatpush1.bf16.msra.mxu1 %v6004_v3  ;;  %v6011_v8 = vld [vmem:[#allocation5 + $0x94] ss:$36 sps:$4 sm:$0xff]   ;;  %v6013_v9 = vld [vmem:[#allocation5 + $0x9c] ss:$36 sps:$4 sm:$0xff]  }
  0x29   :  { %v6009_v6 = vld [vmem:[#allocation5 + $0x48] ss:$36 sps:$4 sm:$0xff]   ;;  %4110 = vmatprep.subr.bf16.mxu0 %v6005_v4  ;;  %v6010_v7 = vld [vmem:[#allocation5 + $0x50] ss:$36 sps:$4 sm:$0xff]   ;;  %4315 = vmatprep.subr.bf16.mxu1 %v6007_v5  ;;  %v6016_v11 = vld [vmem:[#allocation5 + $0x98] ss:$36 sps:$4 sm:$0xff]  }
  0x2a   :  { %v6015_v10 = vld [vmem:[#allocation5 + $0x90] ss:$36 sps:$4 sm:$0xff]   ;;  %v6017_v12 = vld [vmem:[#allocation5 + $0xdc] ss:$36 sps:$4 sm:$0xff]   ;;  %v6019_v13 = vld [vmem:[#allocation5 + $0xe4] ss:$36 sps:$4 sm:$0xff]  }
  0x2b   :  { %v6021_v14 = vld [vmem:[#allocation5 + $0xd8] ss:$36 sps:$4 sm:$0xff]   ;;  %v6022_v15 = vld [vmem:[#allocation5 + $0xe0] ss:$36 sps:$4 sm:$0xff]   ;;  %v6025_v17 = vld [vmem:[#allocation5 + $0x12c] ss:$36 sps:$4 sm:$0xff]  }
  0x2c   :  { %4111 = vmatpush1.bf16.msra.mxu0 %v6009_v6  ;;  %4316 = vmatpush1.bf16.msra.mxu1 %v6010_v7  ;;  %v6023_v16 = vld [vmem:[#allocation5 + $0x124] ss:$36 sps:$4 sm:$0xff]   ;;  %v6029_v20 = vld [vmem:[#allocation5 + $0x16c] ss:$36 sps:$4 sm:$0xff]   ;;  %v6031_v21 = vld [vmem:[#allocation5 + $0x174] ss:$36 sps:$4 sm:$0xff]  }
  0x2d   :  { %4112 = vmatprep.subr.bf16.mxu0 %v6011_v8  ;;  %4317 = vmatprep.subr.bf16.mxu1 %v6013_v9  ;;  %v6027_v18 = vld [vmem:[#allocation5 + $0x120] ss:$36 sps:$4 sm:$0xff]   ;;  %v6028_v19 = vld [vmem:[#allocation5 + $0x128] ss:$36 sps:$4 sm:$0xff]   ;;  %v6034_v23 = vld [vmem:[#allocation5 + $0x170] ss:$36 sps:$4 sm:$0xff]  }
  0x2e   :  { %v6033_v22 = vld [vmem:[#allocation5 + $0x168] ss:$36 sps:$4 sm:$0xff]   ;;  %v6035_v24 = vld [vmem:[#allocation5 + $0x1b4] ss:$36 sps:$4 sm:$0xff]   ;;  %v6037_v25 = vld [vmem:[#allocation5 + $0x1bc] ss:$36 sps:$4 sm:$0xff]  }
  0x2f   :  { %v6039_v26 = vld [vmem:[#allocation5 + $0x1b0] ss:$36 sps:$4 sm:$0xff]   ;;  %v6040_v27 = vld [vmem:[#allocation5 + $0x1b8] ss:$36 sps:$4 sm:$0xff]   ;;  %v6043_v29 = vld [vmem:[#allocation5 + $0x204] ss:$36 sps:$4 sm:$0xff]  }
  0x30   :  { %4113 = vmatpush1.bf16.msra.mxu0 %v6015_v10  ;;  %4318 = vmatpush1.bf16.msra.mxu1 %v6016_v11  ;;  %v6041_v28 = vld [vmem:[#allocation5 + $0x1fc] ss:$36 sps:$4 sm:$0xff]   ;;  %v6047_v32 = vld [vmem:[#allocation5 + $0x244] ss:$36 sps:$4 sm:$0xff]   ;;  %v6049_v33 = vld [vmem:[#allocation5 + $0x24c] ss:$36 sps:$4 sm:$0xff]  }
  0x31   :  { %4114 = vmatprep.subr.bf16.mxu0 %v6017_v12  ;;  %4319 = vmatprep.subr.bf16.mxu1 %v6019_v13  ;;  %v6045_v30 = vld [vmem:[#allocation5 + $0x1f8] ss:$36 sps:$4 sm:$0xff]   ;;  %v6046_v31 = vld [vmem:[#allocation5 + $0x200] ss:$36 sps:$4 sm:$0xff]   ;;  %v6052_v35 = vld [vmem:[#allocation5 + $0x248] ss:$36 sps:$4 sm:$0xff]  }
  0x32   :  { %v6051_v34 = vld [vmem:[#allocation5 + $0x240] ss:$36 sps:$4 sm:$0xff]   ;;  %v6053_v36 = vld [vmem:[#allocation5 + $0x28c] ss:$36 sps:$4 sm:$0xff]   ;;  %v6055_v37 = vld [vmem:[#allocation5 + $0x294] ss:$36 sps:$4 sm:$0xff]  }
  0x33   :  { %v6057_v38 = vld [vmem:[#allocation5 + $0x288] ss:$36 sps:$4 sm:$0xff]   ;;  %v6058_v39 = vld [vmem:[#allocation5 + $0x290] ss:$36 sps:$4 sm:$0xff]   ;;  %v6061_v41 = vld [vmem:[#allocation5 + $0x2dc] ss:$36 sps:$4 sm:$0xff]  }
  0x34   :  { %4115 = vmatpush1.bf16.msra.mxu0 %v6021_v14  ;;  %4320 = vmatpush1.bf16.msra.mxu1 %v6022_v15  ;;  %v6059_v40 = vld [vmem:[#allocation5 + $0x2d4] ss:$36 sps:$4 sm:$0xff]   ;;  %v6065_v44 = vld [vmem:[#allocation5 + $0x31c] ss:$36 sps:$4 sm:$0xff]   ;;  %v6067_v45 = vld [vmem:[#allocation5 + $0x324] ss:$36 sps:$4 sm:$0xff]  }
  0x35   :  { %4116 = vmatprep.subr.bf16.mxu0 %v6023_v16  ;;  %4321 = vmatprep.subr.bf16.mxu1 %v6025_v17  ;;  %v6063_v42 = vld [vmem:[#allocation5 + $0x2d0] ss:$36 sps:$4 sm:$0xff]   ;;  %v6064_v43 = vld [vmem:[#allocation5 + $0x2d8] ss:$36 sps:$4 sm:$0xff]   ;;  %v6070_v49 = vld [vmem:[#allocation5 + $0x320] ss:$36 sps:$4 sm:$0xff]  }
  0x36   :  { %v39_v46 = vld [vmem:[#allocation2] sm:$0xff]  ;;  %v6071_v50 = vld [vmem:[#allocation5 + $0x364] ss:$36 sps:$4 sm:$0xff]   ;;  %v6073_v51 = vld [vmem:[#allocation5 + $0x36c] ss:$36 sps:$4 sm:$0xff]   ;;  %vm7023_vm0 = vmmov 0  }
  0x37   :  { %v6069_v47 = vld [vmem:[#allocation5 + $0x318] ss:$36 sps:$4 sm:$0xff]   ;;  %v7071_v48 = vcombine.high %v39_v46, %v39_v46  ;;  %v6075_v52 = vld [vmem:[#allocation5 + $0x360] ss:$36 sps:$4 sm:$0xff]   ;;  %v6076_v53 = vld [vmem:[#allocation5 + $0x368] ss:$36 sps:$4 sm:$0xff]   ;;  %v7075_v5 = vcombine.low %v39_v46, %v39_v46 }
  0x38   :  { %4117 = vmatpush1.bf16.msra.mxu0 %v6027_v18  ;;  %4322 = vmatpush1.bf16.msra.mxu1 %v6028_v19  ;;  %v6077_v54 = vld [vmem:[#allocation5 + $0x3ac] ss:$36 sps:$4 sm:$0xff]   ;;  %v6079_v55 = vld [vmem:[#allocation5 + $0x3b4] ss:$36 sps:$4 sm:$0xff]   ;;  %v6085_v59 = vld [vmem:[#allocation5 + $0x3fc] ss:$36 sps:$4 sm:$0xff]  }
  0x39   :  { %4118 = vmatprep.subr.bf16.mxu0 %v6029_v20  ;;  %4323 = vmatprep.subr.bf16.mxu1 %v6031_v21  ;;  %v6081_v56 = vld [vmem:[#allocation5 + $0x3a8] ss:$36 sps:$4 sm:$0xff]   ;;  %v6082_v57 = vld [vmem:[#allocation5 + $0x3b0] ss:$36 sps:$4 sm:$0xff]   ;;  %v6088_v61 = vld [vmem:[#allocation5 + $0x3f8] ss:$36 sps:$4 sm:$0xff]  }
  0x3a   :  { %4140 = vmatprep.mubr.bf16.mxu0 %v7071_v48  ;;  %4345 = vmatprep.mubr.bf16.mxu1 %v7071_v48  ;;  %v6083_v58 = vld [vmem:[#allocation5 + $0x3f4] ss:$36 sps:$4 sm:$0xff]   ;;  %v6089_v62 = vld [vmem:[#allocation5 + $0x43c] ss:$36 sps:$4 sm:$0xff]   ;;  %v6091_v63 = vld [vmem:[#allocation5 + $0x444] ss:$36 sps:$4 sm:$0xff]  }
  0x3b   :  { %v6087_v60 = vld [vmem:[#allocation5 + $0x3f0] ss:$36 sps:$4 sm:$0xff]   ;;  %v6093_v0 = vld [vmem:[#allocation5 + $0x438] ss:$36 sps:$4 sm:$0xff]   ;;  %v6094_v1 = vld [vmem:[#allocation5 + $0x440] ss:$36 sps:$4 sm:$0xff]  }
  0x3c   :  { %4119 = vmatpush1.bf16.msra.mxu0 %v6033_v22  ;;  %4324 = vmatpush1.bf16.msra.mxu1 %v6034_v23  ;;  %v6098_v2 = vld [vmem:[#allocation5 + $0x484] ss:$36 sps:$4 sm:$0xff]   ;;  %v6101_v3 = vld [vmem:[#allocation5 + $0x48c] ss:$36 sps:$4 sm:$0xff]   ;;  %v6108_v8 = vld [vmem:[#allocation5 + $0x4d4] ss:$36 sps:$4 sm:$0xff]  }
  0x3d   :  { %4120 = vmatprep.subr.bf16.mxu0 %v6035_v24  ;;  %4325 = vmatprep.subr.bf16.mxu1 %v6037_v25  ;;  %v6096_v4 = vld [vmem:[#allocation5 + $0x480] ss:$36 sps:$4 sm:$0xff]   ;;  %v6099_v6 = vld [vmem:[#allocation5 + $0x488] ss:$36 sps:$4 sm:$0xff]   ;;  %v6106_v10 = vld [vmem:[#allocation5 + $0x4d0] ss:$36 sps:$4 sm:$0xff]  }
  0x3e   :  { %v6105_v7 = vld [vmem:[#allocation5 + $0x4cc] ss:$36 sps:$4 sm:$0xff]   ;;  %v6111_v11 = vld [vmem:[#allocation5 + $0x514] ss:$36 sps:$4 sm:$0xff]   ;;  %v6114_v12 = vld [vmem:[#allocation5 + $0x51c] ss:$36 sps:$4 sm:$0xff]  }
  0x3f   :  { %v6103_v9 = vld [vmem:[#allocation5 + $0x4c8] ss:$36 sps:$4 sm:$0xff]   ;;  %v6109_v13 = vld [vmem:[#allocation5 + $0x510] ss:$36 sps:$4 sm:$0xff]   ;;  %v6112_v14 = vld [vmem:[#allocation5 + $0x518] ss:$36 sps:$4 sm:$0xff]  }
  0x40   :  { %4121 = vmatpush1.bf16.msra.mxu0 %v6039_v26  ;;  %4326 = vmatpush1.bf16.msra.mxu1 %v6040_v27  ;;  %v6117_v15 = vld [vmem:[#allocation5 + $0x55c] ss:$36 sps:$4 sm:$0xff]   ;;  %v6120_v16 = vld [vmem:[#allocation5 + $0x564] ss:$36 sps:$4 sm:$0xff]   ;;  %v6126_v20 = vld [vmem:[#allocation5 + $0x5ac] ss:$36 sps:$4 sm:$0xff]  }
  0x41   :  { %4122 = vmatprep.subr.bf16.mxu0 %v6041_v28  ;;  %4327 = vmatprep.subr.bf16.mxu1 %v6043_v29  ;;  %v6115_v17 = vld [vmem:[#allocation5 + $0x558] ss:$36 sps:$4 sm:$0xff]   ;;  %v6118_v18 = vld [vmem:[#allocation5 + $0x560] ss:$36 sps:$4 sm:$0xff]   ;;  %v6124_v22 = vld [vmem:[#allocation5 + $0x5a8] ss:$36 sps:$4 sm:$0xff]  }
  0x42   :  { %v6123_v19 = vld [vmem:[#allocation5 + $0x5a4] ss:$36 sps:$4 sm:$0xff]   ;;  %v6129_v23 = vld [vmem:[#allocation5 + $0x5ec] ss:$36 sps:$4 sm:$0xff]   ;;  %v6132_v24 = vld [vmem:[#allocation5 + $0x5f4] ss:$36 sps:$4 sm:$0xff]  }
  0x43   :  { %v6121_v21 = vld [vmem:[#allocation5 + $0x5a0] ss:$36 sps:$4 sm:$0xff]   ;;  %v6127_v25 = vld [vmem:[#allocation5 + $0x5e8] ss:$36 sps:$4 sm:$0xff]   ;;  %v6130_v26 = vld [vmem:[#allocation5 + $0x5f0] ss:$36 sps:$4 sm:$0xff]  }
  0x44   :  { %4123 = vmatpush1.bf16.msra.mxu0 %v6045_v30  ;;  %4328 = vmatpush1.bf16.msra.mxu1 %v6046_v31  ;;  %v6135_v27 = vld [vmem:[#allocation5 + $0x634] ss:$36 sps:$4 sm:$0xff]   ;;  %v6138_v28 = vld [vmem:[#allocation5 + $0x63c] ss:$36 sps:$4 sm:$0xff]   ;;  %v7079_v29 = vld [vmem:[#allocation2 + $0x8] sm:$0xff]  ;;  %s7024_s1 = smov [#allocation7]  }
  0x45   :  { %4124 = vmatprep.subr.bf16.mxu0 %v6047_v32  ;;  %4329 = vmatprep.subr.bf16.mxu1 %v6049_v33  ;;  %v7083_v30 = vcombine.high %v7079_v29, %v7079_v29  ;;  %v6133_v31 = vld [vmem:[#allocation5 + $0x630] ss:$36 sps:$4 sm:$0xff]   ;;  %v6136_v32 = vld [vmem:[#allocation5 + $0x638] ss:$36 sps:$4 sm:$0xff]   ;;  %s5143_s6 = sshll.u32 %s7024_s1, 4  ;;  %s5144_s6 = int_to_ptr.vmem [resolvable:$true] %s5143_s6 }
  0x46   :  { %v6141_v33 = vld [vmem:[#allocation5 + $0x67c] ss:$36 sps:$4 sm:$0xff]   ;;  %s6989_s7 = scalar_lea.vmem %s5144_s6, 1152  ;;  %p6994_p3 = scmp.lt.s32.totalorder %s5144_s6, %s5144_s6 }
  0x47   :  { %v6162_v46 = vld [vmem:[#allocation5 + $0x75c] ss:$36 sps:$4 sm:$0xff]   ;;  %p6990_p2 = scmp.ne.s32.totalorder %s5144_s6, %s6989_s7  ;;  %p6995_p4 = scmp.lt.s32.totalorder %s6989_s7, %s6989_s7 }
  0x48   :  { %4125 = vmatpush1.bf16.msra.mxu0 %v6051_v34  ;;  %4330 = vmatpush1.bf16.msra.mxu1 %v6052_v35  ;;  %v6144_v34 = vld [vmem:[#allocation5 + $0x684] ss:$36 sps:$4 sm:$0xff]   ;;  %v6139_v35 = vld [vmem:[#allocation5 + $0x678] ss:$36 sps:$4 sm:$0xff]  }
  0x49   :  { %4126 = vmatprep.subr.bf16.mxu0 %v6053_v36  ;;  %4331 = vmatprep.subr.bf16.mxu1 %v6055_v37  ;;  %v6142_v36 = vld [vmem:[#allocation5 + $0x680] ss:$36 sps:$4 sm:$0xff]   ;;  %p6996_p5 = por %p6995_p4, %p6994_p3 }
  0x4a   :  { %v6147_v37 = vld [vmem:[#allocation5 + $0x6c4] ss:$36 sps:$4 sm:$0xff]  }
  0x4b   :  { %p6997_p6 = pnand %p6996_p5, %p6990_p2 }
  0x4c   :  { %4127 = vmatpush1.bf16.msra.mxu0 %v6057_v38  ;;  %4332 = vmatpush1.bf16.msra.mxu1 %v6058_v39  ;;  %v6150_v38 = vld [vmem:[#allocation5 + $0x6cc] ss:$36 sps:$4 sm:$0xff]   ;;  %v6145_v39 = vld [vmem:[#allocation5 + $0x6c0] ss:$36 sps:$4 sm:$0xff]  }
  0x4d   :  { %4128 = vmatprep.subr.bf16.mxu0 %v6059_v40  ;;  %4333 = vmatprep.subr.bf16.mxu1 %v6061_v41  ;;  %v6148_v40 = vld [vmem:[#allocation5 + $0x6c8] ss:$36 sps:$4 sm:$0xff]  }
  0x4e   :  { %v6153_v41 = vld [vmem:[#allocation5 + $0x70c] ss:$36 sps:$4 sm:$0xff]  }
  0x50   :  { %4129 = vmatpush1.bf16.msra.mxu0 %v6063_v42  ;;  %4334 = vmatpush1.bf16.msra.mxu1 %v6064_v43  ;;  %v6156_v42 = vld [vmem:[#allocation5 + $0x714] ss:$36 sps:$4 sm:$0xff]   ;;  %v6151_v43 = vld [vmem:[#allocation5 + $0x708] ss:$36 sps:$4 sm:$0xff]  }
  0x51   :  { %4130 = vmatprep.subr.bf16.mxu0 %v6065_v44  ;;  %4335 = vmatprep.subr.bf16.mxu1 %v6067_v45  ;;  %v6154_v44 = vld [vmem:[#allocation5 + $0x710] ss:$36 sps:$4 sm:$0xff]  }
  0x52   :  { %v6159_v45 = vld [vmem:[#allocation5 + $0x754] ss:$36 sps:$4 sm:$0xff]  }
  0x54   :  { %4131 = vmatpush1.bf16.msra.mxu0 %v6069_v47  ;;  %4336 = vmatpush1.bf16.msra.mxu1 %v6070_v49  ;;  %v6157_v47 = vld [vmem:[#allocation5 + $0x750] ss:$36 sps:$4 sm:$0xff]   ;;  %v6160_v49 = vld [vmem:[#allocation5 + $0x758] ss:$36 sps:$4 sm:$0xff]  }
  0x55   :  { %4132 = vmatprep.subr.bf16.mxu0 %v6071_v50  ;;  %4337 = vmatprep.subr.bf16.mxu1 %v6073_v51  ;;  %v6165_v50 = vld [vmem:[#allocation5 + $0x79c] ss:$36 sps:$4 sm:$0xff]   ;;  %v6168_v51 = vld [vmem:[#allocation5 + $0x7a4] ss:$36 sps:$4 sm:$0xff]  }
  0x58   :  { %4133 = vmatpush1.bf16.msra.mxu0 %v6075_v52  ;;  %4338 = vmatpush1.bf16.msra.mxu1 %v6076_v53  ;;  %v6163_v52 = vld [vmem:[#allocation5 + $0x798] ss:$36 sps:$4 sm:$0xff]   ;;  %v6166_v53 = vld [vmem:[#allocation5 + $0x7a0] ss:$36 sps:$4 sm:$0xff]  }
  0x59   :  { %4134 = vmatprep.subr.bf16.mxu0 %v6077_v54  ;;  %4339 = vmatprep.subr.bf16.mxu1 %v6079_v55  ;;  %v6171_v54 = vld [vmem:[#allocation5 + $0x7e4] ss:$36 sps:$4 sm:$0xff]   ;;  %v6174_v55 = vld [vmem:[#allocation5 + $0x7ec] ss:$36 sps:$4 sm:$0xff]  }
  0x5c   :  { %4135 = vmatpush1.bf16.msra.mxu0 %v6081_v56  ;;  %4340 = vmatpush1.bf16.msra.mxu1 %v6082_v57  ;;  %v6169_v56 = vld [vmem:[#allocation5 + $0x7e0] ss:$36 sps:$4 sm:$0xff]   ;;  %v6172_v57 = vld [vmem:[#allocation5 + $0x7e8] ss:$36 sps:$4 sm:$0xff]  }
  0x5d   :  { %4136 = vmatprep.subr.bf16.mxu0 %v6083_v58  ;;  %4341 = vmatprep.subr.bf16.mxu1 %v6085_v59  ;;  %v6177_v58 = vld [vmem:[#allocation5 + $0x82c] ss:$36 sps:$4 sm:$0xff]   ;;  %v6180_v59 = vld [vmem:[#allocation5 + $0x834] ss:$36 sps:$4 sm:$0xff]  }
  0x60   :  { %4137 = vmatpush1.bf16.msra.mxu0 %v6087_v60  ;;  %4342 = vmatpush1.bf16.msra.mxu1 %v6088_v61  ;;  %v6175_v60 = vld [vmem:[#allocation5 + $0x828] ss:$36 sps:$4 sm:$0xff]   ;;  %v6178_v61 = vld [vmem:[#allocation5 + $0x830] ss:$36 sps:$4 sm:$0xff]  }
  0x61   :  { %4138 = vmatprep.subr.bf16.mxu0 %v6089_v62  ;;  %4343 = vmatprep.subr.bf16.mxu1 %v6091_v63  ;;  %v6183_v62 = vld [vmem:[#allocation5 + $0x874] ss:$36 sps:$4 sm:$0xff]   ;;  %v6186_v63 = vld [vmem:[#allocation5 + $0x87c] ss:$36 sps:$4 sm:$0xff]  }
  0x64   :  { %4139 = vmatpush1.bf16.msra.mxu0 %v6093_v0  ;;  %4344 = vmatpush1.bf16.msra.mxu1 %v6094_v1  ;;  %v6181_v0 = vld [vmem:[#allocation5 + $0x870] ss:$36 sps:$4 sm:$0xff]   ;;  %v6184_v1 = vld [vmem:[#allocation5 + $0x878] ss:$36 sps:$4 sm:$0xff]  }
  0x65   :  { %4149 = vmatprep.subr.bf16.mxu0 %v6098_v2  ;;  %4354 = vmatprep.subr.bf16.mxu1 %v6101_v3  ;;  %v6189_v2 = vld [vmem:[#allocation5 + $0x8bc] ss:$36 sps:$4 sm:$0xff]   ;;  %v6192_v3 = vld [vmem:[#allocation5 + $0x8c4] ss:$36 sps:$4 sm:$0xff]  }
  0x67   :  { %4141 = vmatmul.mubr.bf16.vlgmr.msra.gmra.mrb[0].mxu0 %v7075_v5  ;;  %4346 = vmatmul.mubr.bf16.vlgmr.msra.gmra.mrb[0].mxu1 %v7075_v5 }
  0x68   :  { %4150 = vmatpush1.bf16.msra.mxu0 %v6096_v4  ;;  %4355 = vmatpush1.bf16.msra.mxu1 %v6099_v6  ;;  %v6187_v4 = vld [vmem:[#allocation5 + $0x8b8] ss:$36 sps:$4 sm:$0xff]   ;;  %v6190_v6 = vld [vmem:[#allocation5 + $0x8c0] ss:$36 sps:$4 sm:$0xff]  }
  0x69   :  { %4151 = vmatprep.subr.bf16.mxu0 %v6105_v7  ;;  %4356 = vmatprep.subr.bf16.mxu1 %v6108_v8  ;;  %v6196_v7 = vld [vmem:[#allocation5 + $0x904] ss:$36 sps:$4 sm:$0xff]   ;;  %v6199_v8 = vld [vmem:[#allocation5 + $0x90c] ss:$36 sps:$4 sm:$0xff]  }
  0x6a   :  { %4181 = vmatprep.mubr.bf16.mxu0 %v7083_v30  ;;  %4386 = vmatprep.mubr.bf16.mxu1 %v7083_v30 }
  0x6c   :  { %4152 = vmatpush1.bf16.msra.mxu0 %v6103_v9  ;;  %4357 = vmatpush1.bf16.msra.mxu1 %v6106_v10  ;;  %v6194_v9 = vld [vmem:[#allocation5 + $0x900] ss:$36 sps:$4 sm:$0xff]   ;;  %v7089_v10 = vcombine.low %v7079_v29, %v7079_v29  ;;  %v6222_v29 = vld [vmem:[#allocation5 + $0xa28] ss:$36 sps:$4 sm:$0xff]  }
  0x6d   :  { %4153 = vmatprep.subr.bf16.mxu0 %v6111_v11  ;;  %4358 = vmatprep.subr.bf16.mxu1 %v6114_v12  ;;  %v6197_v11 = vld [vmem:[#allocation5 + $0x908] ss:$36 sps:$4 sm:$0xff]  }
  0x6e   :  { %v6203_v12 = vld [vmem:[#allocation5 + $0x94c] ss:$36 sps:$4 sm:$0xff]  }
  0x70   :  { %4154 = vmatpush1.bf16.msra.mxu0 %v6109_v13  ;;  %4359 = vmatpush1.bf16.msra.mxu1 %v6112_v14  ;;  %v7091_v13 = vld [vmem:[#allocation2 + $0x10] sm:$0xff]  ;;  %v6206_v14 = vld [vmem:[#allocation5 + $0x954] ss:$36 sps:$4 sm:$0xff]  }
  0x71   :  { %4155 = vmatprep.subr.bf16.mxu0 %v6117_v15  ;;  %4360 = vmatprep.subr.bf16.mxu1 %v6120_v16  ;;  %v7095_v15 = vcombine.high %v7091_v13, %v7091_v13  ;;  %v6201_v16 = vld [vmem:[#allocation5 + $0x948] ss:$36 sps:$4 sm:$0xff]  }
  0x74   :  { %4156 = vmatpush1.bf16.msra.mxu0 %v6115_v17  ;;  %4361 = vmatpush1.bf16.msra.mxu1 %v6118_v18  ;;  %v6204_v17 = vld [vmem:[#allocation5 + $0x950] ss:$36 sps:$4 sm:$0xff]  }
  0x75   :  { %4157 = vmatprep.subr.bf16.mxu0 %v6123_v19  ;;  %4362 = vmatprep.subr.bf16.mxu1 %v6126_v20  ;;  %v6209_v18 = vld [vmem:[#allocation5 + $0x994] ss:$36 sps:$4 sm:$0xff]   ;;  %v6212_v19 = vld [vmem:[#allocation5 + $0x99c] ss:$36 sps:$4 sm:$0xff]  }
  0x76   :  { %v6207_v20 = vld [vmem:[#allocation5 + $0x990] ss:$36 sps:$4 sm:$0xff]  }
  0x78   :  { %4158 = vmatpush1.bf16.msra.mxu0 %v6121_v21  ;;  %4363 = vmatpush1.bf16.msra.mxu1 %v6124_v22  ;;  %v6210_v21 = vld [vmem:[#allocation5 + $0x998] ss:$36 sps:$4 sm:$0xff]  }
  0x79   :  { %4159 = vmatprep.subr.bf16.mxu0 %v6129_v23  ;;  %4364 = vmatprep.subr.bf16.mxu1 %v6132_v24  ;;  %v6215_v22 = vld [vmem:[#allocation5 + $0x9dc] ss:$36 sps:$4 sm:$0xff]   ;;  %v6218_v23 = vld [vmem:[#allocation5 + $0x9e4] ss:$36 sps:$4 sm:$0xff]  }
  0x7a   :  { %v6213_v24 = vld [vmem:[#allocation5 + $0x9d8] ss:$36 sps:$4 sm:$0xff]  }
  0x7c   :  { %4160 = vmatpush1.bf16.msra.mxu0 %v6127_v25  ;;  %4365 = vmatpush1.bf16.msra.mxu1 %v6130_v26  ;;  %v6216_v25 = vld [vmem:[#allocation5 + $0x9e0] ss:$36 sps:$4 sm:$0xff]  }
  0x7d   :  { %4161 = vmatprep.subr.bf16.mxu0 %v6135_v27  ;;  %4366 = vmatprep.subr.bf16.mxu1 %v6138_v28  ;;  %v6221_v26 = vld [vmem:[#allocation5 + $0xa24] ss:$36 sps:$4 sm:$0xff]   ;;  %v6224_v27 = vld [vmem:[#allocation5 + $0xa2c] ss:$36 sps:$4 sm:$0xff]  }
  0x7e   :  { %v6219_v28 = vld [vmem:[#allocation5 + $0xa20] ss:$36 sps:$4 sm:$0xff]  }
  0x80   :  { %4162 = vmatpush1.bf16.msra.mxu0 %v6133_v31  ;;  %4367 = vmatpush1.bf16.msra.mxu1 %v6136_v32  ;;  %v6227_v31 = vld [vmem:[#allocation5 + $0xa6c] ss:$36 sps:$4 sm:$0xff]   ;;  %v6230_v32 = vld [vmem:[#allocation5 + $0xa74] ss:$36 sps:$4 sm:$0xff]  }
  0x81   :  { %4163 = vmatprep.subr.bf16.mxu0 %v6141_v33  ;;  %4368 = vmatprep.subr.bf16.mxu1 %v6144_v34  ;;  %v6225_v33 = vld [vmem:[#allocation5 + $0xa68] ss:$36 sps:$4 sm:$0xff]   ;;  %v6228_v34 = vld [vmem:[#allocation5 + $0xa70] ss:$36 sps:$4 sm:$0xff]  }
  0x84   :  { %4164 = vmatpush1.bf16.msra.mxu0 %v6139_v35  ;;  %4369 = vmatpush1.bf16.msra.mxu1 %v6142_v36  ;;  %v6233_v35 = vld [vmem:[#allocation5 + $0xab4] ss:$36 sps:$4 sm:$0xff]   ;;  %v6236_v36 = vld [vmem:[#allocation5 + $0xabc] ss:$36 sps:$4 sm:$0xff]  }
  0x85   :  { %4165 = vmatprep.subr.bf16.mxu0 %v6147_v37  ;;  %4370 = vmatprep.subr.bf16.mxu1 %v6150_v38  ;;  %v6231_v37 = vld [vmem:[#allocation5 + $0xab0] ss:$36 sps:$4 sm:$0xff]   ;;  %v6234_v38 = vld [vmem:[#allocation5 + $0xab8] ss:$36 sps:$4 sm:$0xff]  }
  0x88   :  { %4166 = vmatpush1.bf16.msra.mxu0 %v6145_v39  ;;  %4371 = vmatpush1.bf16.msra.mxu1 %v6148_v40  ;;  %v6239_v39 = vld [vmem:[#allocation5 + $0xafc] ss:$36 sps:$4 sm:$0xff]   ;;  %v6242_v40 = vld [vmem:[#allocation5 + $0xb04] ss:$36 sps:$4 sm:$0xff]  }
  0x89   :  { %4167 = vmatprep.subr.bf16.mxu0 %v6153_v41  ;;  %4372 = vmatprep.subr.bf16.mxu1 %v6156_v42  ;;  %v6237_v41 = vld [vmem:[#allocation5 + $0xaf8] ss:$36 sps:$4 sm:$0xff]   ;;  %v6240_v42 = vld [vmem:[#allocation5 + $0xb00] ss:$36 sps:$4 sm:$0xff]  }
  0x8c   :  { %4168 = vmatpush1.bf16.msra.mxu0 %v6151_v43  ;;  %4373 = vmatpush1.bf16.msra.mxu1 %v6154_v44  ;;  %v6245_v43 = vld [vmem:[#allocation5 + $0xb44] ss:$36 sps:$4 sm:$0xff]   ;;  %v6248_v44 = vld [vmem:[#allocation5 + $0xb4c] ss:$36 sps:$4 sm:$0xff]  }
  0x8d   :  { %4169 = vmatprep.subr.bf16.mxu0 %v6159_v45  ;;  %4374 = vmatprep.subr.bf16.mxu1 %v6162_v46  ;;  %v6243_v45 = vld [vmem:[#allocation5 + $0xb40] ss:$36 sps:$4 sm:$0xff]   ;;  %v6246_v46 = vld [vmem:[#allocation5 + $0xb48] ss:$36 sps:$4 sm:$0xff]  }
  0x90   :  { %4170 = vmatpush1.bf16.msra.mxu0 %v6157_v47  ;;  %4375 = vmatpush1.bf16.msra.mxu1 %v6160_v49  ;;  %v6251_v47 = vld [vmem:[#allocation5 + $0xb8c] ss:$36 sps:$4 sm:$0xff]   ;;  %v6254_v49 = vld [vmem:[#allocation5 + $0xb94] ss:$36 sps:$4 sm:$0xff]  }
  0x91   :  { %4171 = vmatprep.subr.bf16.mxu0 %v6165_v50  ;;  %4376 = vmatprep.subr.bf16.mxu1 %v6168_v51  ;;  %v6249_v50 = vld [vmem:[#allocation5 + $0xb88] ss:$36 sps:$4 sm:$0xff]   ;;  %v6252_v51 = vld [vmem:[#allocation5 + $0xb90] ss:$36 sps:$4 sm:$0xff]  }
  0x94   :  { %4172 = vmatpush1.bf16.msra.mxu0 %v6163_v52  ;;  %4377 = vmatpush1.bf16.msra.mxu1 %v6166_v53  ;;  %v6257_v52 = vld [vmem:[#allocation5 + $0xbd4] ss:$36 sps:$4 sm:$0xff]   ;;  %v6260_v53 = vld [vmem:[#allocation5 + $0xbdc] ss:$36 sps:$4 sm:$0xff]  }
  0x95   :  { %4173 = vmatprep.subr.bf16.mxu0 %v6171_v54  ;;  %4378 = vmatprep.subr.bf16.mxu1 %v6174_v55  ;;  %v6255_v54 = vld [vmem:[#allocation5 + $0xbd0] ss:$36 sps:$4 sm:$0xff]   ;;  %v6258_v55 = vld [vmem:[#allocation5 + $0xbd8] ss:$36 sps:$4 sm:$0xff]  }
  0x98   :  { %4174 = vmatpush1.bf16.msra.mxu0 %v6169_v56  ;;  %4379 = vmatpush1.bf16.msra.mxu1 %v6172_v57  ;;  %v6263_v56 = vld [vmem:[#allocation5 + $0xc1c] ss:$36 sps:$4 sm:$0xff]   ;;  %v6266_v57 = vld [vmem:[#allocation5 + $0xc24] ss:$36 sps:$4 sm:$0xff]  }
  0x99   :  { %4175 = vmatprep.subr.bf16.mxu0 %v6177_v58  ;;  %4380 = vmatprep.subr.bf16.mxu1 %v6180_v59  ;;  %v6261_v58 = vld [vmem:[#allocation5 + $0xc18] ss:$36 sps:$4 sm:$0xff]   ;;  %v6264_v59 = vld [vmem:[#allocation5 + $0xc20] ss:$36 sps:$4 sm:$0xff]  }
  0x9c   :  { %4176 = vmatpush1.bf16.msra.mxu0 %v6175_v60  ;;  %4381 = vmatpush1.bf16.msra.mxu1 %v6178_v61  ;;  %v6269_v60 = vld [vmem:[#allocation5 + $0xc64] ss:$36 sps:$4 sm:$0xff]   ;;  %v6272_v61 = vld [vmem:[#allocation5 + $0xc6c] ss:$36 sps:$4 sm:$0xff]  }
  0x9d   :  { %4177 = vmatprep.subr.bf16.mxu0 %v6183_v62  ;;  %4382 = vmatprep.subr.bf16.mxu1 %v6186_v63  ;;  %v6267_v62 = vld [vmem:[#allocation5 + $0xc60] ss:$36 sps:$4 sm:$0xff]   ;;  %v6270_v63 = vld [vmem:[#allocation5 + $0xc68] ss:$36 sps:$4 sm:$0xff]  }
  0xa0   :  { %4178 = vmatpush1.bf16.msra.mxu0 %v6181_v0  ;;  %4383 = vmatpush1.bf16.msra.mxu1 %v6184_v1  ;;  %v6275_v0 = vld [vmem:[#allocation5 + $0xcac] ss:$36 sps:$4 sm:$0xff]   ;;  %v6278_v1 = vld [vmem:[#allocation5 + $0xcb4] ss:$36 sps:$4 sm:$0xff]  }
  0xa1   :  { %4179 = vmatprep.subr.bf16.mxu0 %v6189_v2  ;;  %4384 = vmatprep.subr.bf16.mxu1 %v6192_v3  ;;  %v6273_v2 = vld [vmem:[#allocation5 + $0xca8] ss:$36 sps:$4 sm:$0xff]   ;;  %v6276_v3 = vld [vmem:[#allocation5 + $0xcb0] ss:$36 sps:$4 sm:$0xff]  }
  0xa4   :  { %4180 = vmatpush1.bf16.msra.mxu0 %v6187_v4  ;;  %4385 = vmatpush1.bf16.msra.mxu1 %v6190_v6  ;;  %v6281_v4 = vld [vmem:[#allocation5 + $0xcf4] ss:$36 sps:$4 sm:$0xff]   ;;  %v6284_v6 = vld [vmem:[#allocation5 + $0xcfc] ss:$36 sps:$4 sm:$0xff]  }
  0xa5   :  { %4190 = vmatprep.subr.bf16.mxu0 %v6196_v7  ;;  %4395 = vmatprep.subr.bf16.mxu1 %v6199_v8  ;;  %v6279_v7 = vld [vmem:[#allocation5 + $0xcf0] ss:$36 sps:$4 sm:$0xff]   ;;  %v6282_v8 = vld [vmem:[#allocation5 + $0xcf8] ss:$36 sps:$4 sm:$0xff]  }
  0xa7   :  { %4182 = vmatmul.mubr.bf16.vlgmr.msra.gmra.mrb[0].mxu0 %v7089_v10  ;;  %4387 = vmatmul.mubr.bf16.vlgmr.msra.gmra.mrb[0].mxu1 %v7089_v10 }
  0xa8   :  { %4191 = vmatpush1.bf16.msra.mxu0 %v6194_v9  ;;  %4396 = vmatpush1.bf16.msra.mxu1 %v6197_v11  ;;  %v6287_v9 = vld [vmem:[#allocation5 + $0xd3c] ss:$36 sps:$4 sm:$0xff]   ;;  %v6290_v11 = vld [vmem:[#allocation5 + $0xd44] ss:$36 sps:$4 sm:$0xff]  }
  0xa9   :  { %4192 = vmatprep.subr.bf16.mxu0 %v6203_v12  ;;  %4397 = vmatprep.subr.bf16.mxu1 %v6206_v14  ;;  %v6285_v12 = vld [vmem:[#allocation5 + $0xd38] ss:$36 sps:$4 sm:$0xff]   ;;  %v6288_v14 = vld [vmem:[#allocation5 + $0xd40] ss:$36 sps:$4 sm:$0xff]  }
  0xaa   :  { %4222 = vmatprep.mubr.bf16.mxu0 %v7095_v15  ;;  %4427 = vmatprep.mubr.bf16.mxu1 %v7095_v15 }
  0xac   :  { %4193 = vmatpush1.bf16.msra.mxu0 %v6201_v16  ;;  %4398 = vmatpush1.bf16.msra.mxu1 %v6204_v17  ;;  %v6294_v16 = vld [vmem:[#allocation5 + $0xd84] ss:$36 sps:$4 sm:$0xff]   ;;  %v6297_v17 = vld [vmem:[#allocation5 + $0xd8c] ss:$36 sps:$4 sm:$0xff]  }
  0xad   :  { %4194 = vmatprep.subr.bf16.mxu0 %v6209_v18  ;;  %4399 = vmatprep.subr.bf16.mxu1 %v6212_v19  ;;  %v6292_v18 = vld [vmem:[#allocation5 + $0xd80] ss:$36 sps:$4 sm:$0xff]   ;;  %v7103_v19 = vcombine.low %v7091_v13, %v7091_v13  ;;  %v6299_v13 = vld [vmem:[#allocation5 + $0xdc8] ss:$36 sps:$4 sm:$0xff]  }
  0xb0   :  { %4195 = vmatpush1.bf16.msra.mxu0 %v6207_v20  ;;  %4400 = vmatpush1.bf16.msra.mxu1 %v6210_v21  ;;  %v7105_v20 = vld [vmem:[#allocation2 + $0x18] sm:$0xff]  ;;  %v6295_v21 = vld [vmem:[#allocation5 + $0xd88] ss:$36 sps:$4 sm:$0xff]  }
  0xb1   :  { %4196 = vmatprep.subr.bf16.mxu0 %v6215_v22  ;;  %4401 = vmatprep.subr.bf16.mxu1 %v6218_v23  ;;  %v6301_v22 = vld [vmem:[#allocation5 + $0xdcc] ss:$36 sps:$4 sm:$0xff]   ;;  %v6304_v23 = vld [vmem:[#allocation5 + $0xdd4] ss:$36 sps:$4 sm:$0xff]  }
  0xb4   :  { %4197 = vmatpush1.bf16.msra.mxu0 %v6213_v24  ;;  %4402 = vmatpush1.bf16.msra.mxu1 %v6216_v25  ;;  %v7109_v24 = vcombine.high %v7105_v20, %v7105_v20  ;;  %v6302_v25 = vld [vmem:[#allocation5 + $0xdd0] ss:$36 sps:$4 sm:$0xff]  }
  0xb5   :  { %4198 = vmatprep.subr.bf16.mxu0 %v6221_v26  ;;  %4403 = vmatprep.subr.bf16.mxu1 %v6224_v27  ;;  %v6307_v26 = vld [vmem:[#allocation5 + $0xe14] ss:$36 sps:$4 sm:$0xff]   ;;  %v6310_v27 = vld [vmem:[#allocation5 + $0xe1c] ss:$36 sps:$4 sm:$0xff]  }
  0xb8   :  { %4199 = vmatpush1.bf16.msra.mxu0 %v6219_v28  ;;  %4404 = vmatpush1.bf16.msra.mxu1 %v6222_v29  ;;  %v6305_v28 = vld [vmem:[#allocation5 + $0xe10] ss:$36 sps:$4 sm:$0xff]   ;;  %v6308_v29 = vld [vmem:[#allocation5 + $0xe18] ss:$36 sps:$4 sm:$0xff]  }
  0xb9   :  { %4200 = vmatprep.subr.bf16.mxu0 %v6227_v31  ;;  %4405 = vmatprep.subr.bf16.mxu1 %v6230_v32  ;;  %v6313_v31 = vld [vmem:[#allocation5 + $0xe5c] ss:$36 sps:$4 sm:$0xff]   ;;  %v6316_v32 = vld [vmem:[#allocation5 + $0xe64] ss:$36 sps:$4 sm:$0xff]  }
  0xbc   :  { %4201 = vmatpush1.bf16.msra.mxu0 %v6225_v33  ;;  %4406 = vmatpush1.bf16.msra.mxu1 %v6228_v34  ;;  %v6311_v33 = vld [vmem:[#allocation5 + $0xe58] ss:$36 sps:$4 sm:$0xff]   ;;  %v6314_v34 = vld [vmem:[#allocation5 + $0xe60] ss:$36 sps:$4 sm:$0xff]  }
  0xbd   :  { %4202 = vmatprep.subr.bf16.mxu0 %v6233_v35  ;;  %4407 = vmatprep.subr.bf16.mxu1 %v6236_v36  ;;  %v6319_v35 = vld [vmem:[#allocation5 + $0xea4] ss:$36 sps:$4 sm:$0xff]   ;;  %v6322_v36 = vld [vmem:[#allocation5 + $0xeac] ss:$36 sps:$4 sm:$0xff]  }
  0xc0   :  { %4203 = vmatpush1.bf16.msra.mxu0 %v6231_v37  ;;  %4408 = vmatpush1.bf16.msra.mxu1 %v6234_v38  ;;  %v6317_v37 = vld [vmem:[#allocation5 + $0xea0] ss:$36 sps:$4 sm:$0xff]   ;;  %v6320_v38 = vld [vmem:[#allocation5 + $0xea8] ss:$36 sps:$4 sm:$0xff]  }
  0xc1   :  { %4204 = vmatprep.subr.bf16.mxu0 %v6239_v39  ;;  %4409 = vmatprep.subr.bf16.mxu1 %v6242_v40  ;;  %v6325_v39 = vld [vmem:[#allocation5 + $0xeec] ss:$36 sps:$4 sm:$0xff]   ;;  %v6328_v40 = vld [vmem:[#allocation5 + $0xef4] ss:$36 sps:$4 sm:$0xff]  }
  0xc4   :  { %4205 = vmatpush1.bf16.msra.mxu0 %v6237_v41  ;;  %4410 = vmatpush1.bf16.msra.mxu1 %v6240_v42  ;;  %v6323_v41 = vld [vmem:[#allocation5 + $0xee8] ss:$36 sps:$4 sm:$0xff]   ;;  %v6326_v42 = vld [vmem:[#allocation5 + $0xef0] ss:$36 sps:$4 sm:$0xff]  }
  0xc5   :  { %4206 = vmatprep.subr.bf16.mxu0 %v6245_v43  ;;  %4411 = vmatprep.subr.bf16.mxu1 %v6248_v44  ;;  %v6331_v43 = vld [vmem:[#allocation5 + $0xf34] ss:$36 sps:$4 sm:$0xff]   ;;  %v6334_v44 = vld [vmem:[#allocation5 + $0xf3c] ss:$36 sps:$4 sm:$0xff]  }
  0xc8   :  { %4207 = vmatpush1.bf16.msra.mxu0 %v6243_v45  ;;  %4412 = vmatpush1.bf16.msra.mxu1 %v6246_v46  ;;  %v6329_v45 = vld [vmem:[#allocation5 + $0xf30] ss:$36 sps:$4 sm:$0xff]   ;;  %v6332_v46 = vld [vmem:[#allocation5 + $0xf38] ss:$36 sps:$4 sm:$0xff]  }
  0xc9   :  { %4208 = vmatprep.subr.bf16.mxu0 %v6251_v47  ;;  %4413 = vmatprep.subr.bf16.mxu1 %v6254_v49  ;;  %v6337_v47 = vld [vmem:[#allocation5 + $0xf7c] ss:$36 sps:$4 sm:$0xff]   ;;  %v6340_v49 = vld [vmem:[#allocation5 + $0xf84] ss:$36 sps:$4 sm:$0xff]  }
  0xcc   :  { %4209 = vmatpush1.bf16.msra.mxu0 %v6249_v50  ;;  %4414 = vmatpush1.bf16.msra.mxu1 %v6252_v51  ;;  %v6335_v50 = vld [vmem:[#allocation5 + $0xf78] ss:$36 sps:$4 sm:$0xff]   ;;  %v6338_v51 = vld [vmem:[#allocation5 + $0xf80] ss:$36 sps:$4 sm:$0xff]  }
  0xcd   :  { %4210 = vmatprep.subr.bf16.mxu0 %v6257_v52  ;;  %4415 = vmatprep.subr.bf16.mxu1 %v6260_v53  ;;  %v6343_v52 = vld [vmem:[#allocation5 + $0xfc4] ss:$36 sps:$4 sm:$0xff]   ;;  %v6346_v53 = vld [vmem:[#allocation5 + $0xfcc] ss:$36 sps:$4 sm:$0xff]  }
  0xd0   :  { %4211 = vmatpush1.bf16.msra.mxu0 %v6255_v54  ;;  %4416 = vmatpush1.bf16.msra.mxu1 %v6258_v55  ;;  %v6341_v54 = vld [vmem:[#allocation5 + $0xfc0] ss:$36 sps:$4 sm:$0xff]   ;;  %v6344_v55 = vld [vmem:[#allocation5 + $0xfc8] ss:$36 sps:$4 sm:$0xff]  }
  0xd1   :  { %4212 = vmatprep.subr.bf16.mxu0 %v6263_v56  ;;  %4417 = vmatprep.subr.bf16.mxu1 %v6266_v57  ;;  %v6349_v56 = vld [vmem:[#allocation5 + $0x100c] ss:$36 sps:$4 sm:$0xff]   ;;  %v6352_v57 = vld [vmem:[#allocation5 + $0x1014] ss:$36 sps:$4 sm:$0xff]  }
  0xd4   :  { %4213 = vmatpush1.bf16.msra.mxu0 %v6261_v58  ;;  %4418 = vmatpush1.bf16.msra.mxu1 %v6264_v59  ;;  %v6347_v58 = vld [vmem:[#allocation5 + $0x1008] ss:$36 sps:$4 sm:$0xff]   ;;  %v6350_v59 = vld [vmem:[#allocation5 + $0x1010] ss:$36 sps:$4 sm:$0xff]  }
  0xd5   :  { %4214 = vmatprep.subr.bf16.mxu0 %v6269_v60  ;;  %4419 = vmatprep.subr.bf16.mxu1 %v6272_v61  ;;  %v6355_v60 = vld [vmem:[#allocation5 + $0x1054] ss:$36 sps:$4 sm:$0xff]   ;;  %v6358_v61 = vld [vmem:[#allocation5 + $0x105c] ss:$36 sps:$4 sm:$0xff]  }
  0xd8   :  { %4215 = vmatpush1.bf16.msra.mxu0 %v6267_v62  ;;  %4420 = vmatpush1.bf16.msra.mxu1 %v6270_v63  ;;  %v6353_v62 = vld [vmem:[#allocation5 + $0x1050] ss:$36 sps:$4 sm:$0xff]   ;;  %v6356_v63 = vld [vmem:[#allocation5 + $0x1058] ss:$36 sps:$4 sm:$0xff]  }
  0xd9   :  { %4216 = vmatprep.subr.bf16.mxu0 %v6275_v0  ;;  %4421 = vmatprep.subr.bf16.mxu1 %v6278_v1  ;;  %v6361_v0 = vld [vmem:[#allocation5 + $0x109c] ss:$36 sps:$4 sm:$0xff]   ;;  %v6364_v1 = vld [vmem:[#allocation5 + $0x10a4] ss:$36 sps:$4 sm:$0xff]  }
  0xdc   :  { %4217 = vmatpush1.bf16.msra.mxu0 %v6273_v2  ;;  %4422 = vmatpush1.bf16.msra.mxu1 %v6276_v3  ;;  %v6359_v2 = vld [vmem:[#allocation5 + $0x1098] ss:$36 sps:$4 sm:$0xff]   ;;  %v6362_v3 = vld [vmem:[#allocation5 + $0x10a0] ss:$36 sps:$4 sm:$0xff]  }
  0xdd   :  { %4218 = vmatprep.subr.bf16.mxu0 %v6281_v4  ;;  %4423 = vmatprep.subr.bf16.mxu1 %v6284_v6  ;;  %v6367_v4 = vld [vmem:[#allocation5 + $0x10e4] ss:$36 sps:$4 sm:$0xff]   ;;  %v6370_v6 = vld [vmem:[#allocation5 + $0x10ec] ss:$36 sps:$4 sm:$0xff]  }
  0xe0   :  { %4219 = vmatpush1.bf16.msra.mxu0 %v6279_v7  ;;  %4424 = vmatpush1.bf16.msra.mxu1 %v6282_v8  ;;  %v6365_v7 = vld [vmem:[#allocation5 + $0x10e0] ss:$36 sps:$4 sm:$0xff]   ;;  %v6368_v8 = vld [vmem:[#allocation5 + $0x10e8] ss:$36 sps:$4 sm:$0xff]  }
  0xe1   :  { %4220 = vmatprep.subr.bf16.mxu0 %v6287_v9  ;;  %4425 = vmatprep.subr.bf16.mxu1 %v6290_v11  ;;  %v6373_v9 = vld [vmem:[#allocation5 + $0x112c] ss:$36 sps:$4 sm:$0xff]   ;;  %v6376_v11 = vld [vmem:[#allocation5 + $0x1134] ss:$36 sps:$4 sm:$0xff]  }
  0xe4   :  { %4221 = vmatpush1.bf16.msra.mxu0 %v6285_v12  ;;  %4426 = vmatpush1.bf16.msra.mxu1 %v6288_v14  ;;  %v6371_v12 = vld [vmem:[#allocation5 + $0x1128] ss:$36 sps:$4 sm:$0xff]   ;;  %v6374_v14 = vld [vmem:[#allocation5 + $0x1130] ss:$36 sps:$4 sm:$0xff]  }
  0xe5   :  { %4231 = vmatprep.subr.bf16.mxu0 %v6294_v16  ;;  %4436 = vmatprep.subr.bf16.mxu1 %v6297_v17  ;;  %v6379_v16 = vld [vmem:[#allocation5 + $0x1174] ss:$36 sps:$4 sm:$0xff]   ;;  %v6382_v17 = vld [vmem:[#allocation5 + $0x117c] ss:$36 sps:$4 sm:$0xff]  }
  0xe7   :  { %4223 = vmatmul.mubr.bf16.vlgmr.msra.gmra.mrb[0].mxu0 %v7103_v19  ;;  %4428 = vmatmul.mubr.bf16.vlgmr.msra.gmra.mrb[0].mxu1 %v7103_v19 }
  0xe8   :  { %4232 = vmatpush1.bf16.msra.mxu0 %v6292_v18  ;;  %4437 = vmatpush1.bf16.msra.mxu1 %v6295_v21  ;;  %v6377_v18 = vld [vmem:[#allocation5 + $0x1170] ss:$36 sps:$4 sm:$0xff]   ;;  %v6380_v21 = vld [vmem:[#allocation5 + $0x1178] ss:$36 sps:$4 sm:$0xff]  }
  0xe9   :  { %4233 = vmatprep.subr.bf16.mxu0 %v6301_v22  ;;  %4438 = vmatprep.subr.bf16.mxu1 %v6304_v23  ;;  %v6385_v22 = vld [vmem:[#allocation5 + $0x11bc] ss:$36 sps:$4 sm:$0xff]   ;;  %v6388_v23 = vld [vmem:[#allocation5 + $0x11c4] ss:$36 sps:$4 sm:$0xff]  }
  0xea   :  { %4263 = vmatprep.mubr.bf16.mxu0 %v7109_v24  ;;  %4468 = vmatprep.mubr.bf16.mxu1 %v7109_v24 }
  0xec   :  { %4234 = vmatpush1.bf16.msra.mxu0 %v6299_v13  ;;  %4439 = vmatpush1.bf16.msra.mxu1 %v6302_v25  ;;  %v6383_v13 = vld [vmem:[#allocation5 + $0x11b8] ss:$36 sps:$4 sm:$0xff]   ;;  %v6386_v25 = vld [vmem:[#allocation5 + $0x11c0] ss:$36 sps:$4 sm:$0xff]  }
  0xed   :  { %4235 = vmatprep.subr.bf16.mxu0 %v6307_v26  ;;  %4440 = vmatprep.subr.bf16.mxu1 %v6310_v27  ;;  %v6392_v26 = vld [vmem:[#allocation5 + $0x1204] ss:$36 sps:$4 sm:$0xff]   ;;  %v6395_v27 = vld [vmem:[#allocation5 + $0x120c] ss:$36 sps:$4 sm:$0xff]  }
  0xf0   :  { %4236 = vmatpush1.bf16.msra.mxu0 %v6305_v28  ;;  %4441 = vmatpush1.bf16.msra.mxu1 %v6308_v29  ;;  %v7117_v28 = vcombine.low %v7105_v20, %v7105_v20  ;;  %v6390_v29 = vld [vmem:[#allocation5 + $0x1200] ss:$36 sps:$4 sm:$0xff]   ;;  %v6405_v20 = vld [vmem:[#allocation5 + $0x1294] ss:$36 sps:$4 sm:$0xff]  }
  0xf1   :  { %4237 = vmatprep.subr.bf16.mxu0 %v6313_v31  ;;  %4442 = vmatprep.subr.bf16.mxu1 %v6316_v32  ;;  %v6393_v31 = vld [vmem:[#allocation5 + $0x1208] ss:$36 sps:$4 sm:$0xff]  }
  0xf2   :  { %v6399_v32 = vld [vmem:[#allocation5 + $0x124c] ss:$36 sps:$4 sm:$0xff]  }
  0xf4   :  { %4238 = vmatpush1.bf16.msra.mxu0 %v6311_v33  ;;  %4443 = vmatpush1.bf16.msra.mxu1 %v6314_v34  ;;  %v6402_v33 = vld [vmem:[#allocation5 + $0x1254] ss:$36 sps:$4 sm:$0xff]   ;;  %v6397_v34 = vld [vmem:[#allocation5 + $0x1248] ss:$36 sps:$4 sm:$0xff]  }
  0xf5   :  { %4239 = vmatprep.subr.bf16.mxu0 %v6319_v35  ;;  %4444 = vmatprep.subr.bf16.mxu1 %v6322_v36  ;;  %v6400_v35 = vld [vmem:[#allocation5 + $0x1250] ss:$36 sps:$4 sm:$0xff]   ;;  %v6408_v36 = vld [vmem:[#allocation5 + $0x129c] ss:$36 sps:$4 sm:$0xff]  }
  0xf8   :  { %4240 = vmatpush1.bf16.msra.mxu0 %v6317_v37  ;;  %4445 = vmatpush1.bf16.msra.mxu1 %v6320_v38  ;;  %v7021_v37 = vmov 0   ;;  %v6403_v38 = vld [vmem:[#allocation5 + $0x1290] ss:$36 sps:$4 sm:$0xff]  }
  0xf9   :  { %4241 = vmatprep.subr.bf16.mxu0 %v6325_v39  ;;  %4446 = vmatprep.subr.bf16.mxu1 %v6328_v40  ;;  %v6406_v39 = vld [vmem:[#allocation5 + $0x1298] ss:$36 sps:$4 sm:$0xff]  }
  0xfa   :  { %v6411_v40 = vld [vmem:[#allocation5 + $0x12dc] ss:$36 sps:$4 sm:$0xff]  }
  0xfc   :  { %4242 = vmatpush1.bf16.msra.mxu0 %v6323_v41  ;;  %4447 = vmatpush1.bf16.msra.mxu1 %v6326_v42  ;;  %v6414_v41 = vld [vmem:[#allocation5 + $0x12e4] ss:$36 sps:$4 sm:$0xff]   ;;  %v6409_v42 = vld [vmem:[#allocation5 + $0x12d8] ss:$36 sps:$4 sm:$0xff]  }
  0xfd   :  { %4243 = vmatprep.subr.bf16.mxu0 %v6331_v43  ;;  %4448 = vmatprep.subr.bf16.mxu1 %v6334_v44  ;;  %v6412_v43 = vld [vmem:[#allocation5 + $0x12e0] ss:$36 sps:$4 sm:$0xff]  }
  0xfe   :  { %v6417_v44 = vld [vmem:[#allocation5 + $0x1324] ss:$36 sps:$4 sm:$0xff]  }
 0x100   :  { %4244 = vmatpush1.bf16.msra.mxu0 %v6329_v45  ;;  %4449 = vmatpush1.bf16.msra.mxu1 %v6332_v46  ;;  %v6420_v45 = vld [vmem:[#allocation5 + $0x132c] ss:$36 sps:$4 sm:$0xff]   ;;  %v6415_v46 = vld [vmem:[#allocation5 + $0x1320] ss:$36 sps:$4 sm:$0xff]  }
 0x101   :  { %4245 = vmatprep.subr.bf16.mxu0 %v6337_v47  ;;  %4450 = vmatprep.subr.bf16.mxu1 %v6340_v49  ;;  %v6418_v47 = vld [vmem:[#allocation5 + $0x1328] ss:$36 sps:$4 sm:$0xff]  }
 0x102   :  { %v6423_v49 = vld [vmem:[#allocation5 + $0x136c] ss:$36 sps:$4 sm:$0xff]  }
 0x104   :  { %4246 = vmatpush1.bf16.msra.mxu0 %v6335_v50  ;;  %4451 = vmatpush1.bf16.msra.mxu1 %v6338_v51  ;;  %v6426_v50 = vld [vmem:[#allocation5 + $0x1374] ss:$36 sps:$4 sm:$0xff]   ;;  %v6421_v51 = vld [vmem:[#allocation5 + $0x1368] ss:$36 sps:$4 sm:$0xff]  }
 0x105   :  { %4247 = vmatprep.subr.bf16.mxu0 %v6343_v52  ;;  %4452 = vmatprep.subr.bf16.mxu1 %v6346_v53  ;;  %v6424_v52 = vld [vmem:[#allocation5 + $0x1370] ss:$36 sps:$4 sm:$0xff]  }
 0x106   :  { %v6429_v53 = vld [vmem:[#allocation5 + $0x13b4] ss:$36 sps:$4 sm:$0xff]  }
 0x108   :  { %4248 = vmatpush1.bf16.msra.mxu0 %v6341_v54  ;;  %4453 = vmatpush1.bf16.msra.mxu1 %v6344_v55  ;;  %v6432_v54 = vld [vmem:[#allocation5 + $0x13bc] ss:$36 sps:$4 sm:$0xff]   ;;  %v6427_v55 = vld [vmem:[#allocation5 + $0x13b0] ss:$36 sps:$4 sm:$0xff]  }
 0x109   :  { %4249 = vmatprep.subr.bf16.mxu0 %v6349_v56  ;;  %4454 = vmatprep.subr.bf16.mxu1 %v6352_v57  ;;  %v6430_v56 = vld [vmem:[#allocation5 + $0x13b8] ss:$36 sps:$4 sm:$0xff]  }
 0x10a   :  { %v6435_v57 = vld [vmem:[#allocation5 + $0x13fc] ss:$36 sps:$4 sm:$0xff]  }
 0x10c   :  { %4250 = vmatpush1.bf16.msra.mxu0 %v6347_v58  ;;  %4455 = vmatpush1.bf16.msra.mxu1 %v6350_v59  ;;  %v6438_v58 = vld [vmem:[#allocation5 + $0x1404] ss:$36 sps:$4 sm:$0xff]   ;;  %v6433_v59 = vld [vmem:[#allocation5 + $0x13f8] ss:$36 sps:$4 sm:$0xff]  }
 0x10d   :  { %4251 = vmatprep.subr.bf16.mxu0 %v6355_v60  ;;  %4456 = vmatprep.subr.bf16.mxu1 %v6358_v61  ;;  %v6436_v60 = vld [vmem:[#allocation5 + $0x1400] ss:$36 sps:$4 sm:$0xff]   ;;  %v6439_v61 = vld [vmem:[#allocation2 + $0x20] ss:$0 sps:$4 sm:$0xff]  }
 0x110   :  { %4252 = vmatpush1.bf16.msra.mxu0 %v6353_v62  ;;  %4457 = vmatpush1.bf16.msra.mxu1 %v6356_v63  ;;  %v6442_v62 = vld [vmem:[#allocation5 + $0x14] ss:$36 sps:$4 sm:$0xff]   ;;  %v6445_v63 = vld [vmem:[#allocation5 + $0x1c] ss:$36 sps:$4 sm:$0xff]  }
 0x111   :  { %4253 = vmatprep.subr.bf16.mxu0 %v6361_v0  ;;  %4458 = vmatprep.subr.bf16.mxu1 %v6364_v1  ;;  %v6440_v0 = vld [vmem:[#allocation5 + $0x10] ss:$36 sps:$4 sm:$0xff]   ;;  %v6443_v1 = vld [vmem:[#allocation5 + $0x18] ss:$36 sps:$4 sm:$0xff]  }
 0x114   :  { %4254 = vmatpush1.bf16.msra.mxu0 %v6359_v2  ;;  %4459 = vmatpush1.bf16.msra.mxu1 %v6362_v3  ;;  %v6448_v2 = vld [vmem:[#allocation5 + $0x5c] ss:$36 sps:$4 sm:$0xff]   ;;  %v6451_v3 = vld [vmem:[#allocation5 + $0x64] ss:$36 sps:$4 sm:$0xff]  }
 0x115   :  { %4255 = vmatprep.subr.bf16.mxu0 %v6367_v4  ;;  %4460 = vmatprep.subr.bf16.mxu1 %v6370_v6  ;;  %v6446_v4 = vld [vmem:[#allocation5 + $0x58] ss:$36 sps:$4 sm:$0xff]   ;;  %v6449_v6 = vld [vmem:[#allocation5 + $0x60] ss:$36 sps:$4 sm:$0xff]  }
 0x118   :  { %4256 = vmatpush1.bf16.msra.mxu0 %v6365_v7  ;;  %4461 = vmatpush1.bf16.msra.mxu1 %v6368_v8  ;;  %v6454_v7 = vld [vmem:[#allocation5 + $0xa4] ss:$36 sps:$4 sm:$0xff]   ;;  %v6457_v8 = vld [vmem:[#allocation5 + $0xac] ss:$36 sps:$4 sm:$0xff]  }
 0x119   :  { %4257 = vmatprep.subr.bf16.mxu0 %v6373_v9  ;;  %4462 = vmatprep.subr.bf16.mxu1 %v6376_v11  ;;  %v6452_v9 = vld [vmem:[#allocation5 + $0xa0] ss:$36 sps:$4 sm:$0xff]   ;;  %v6455_v11 = vld [vmem:[#allocation5 + $0xa8] ss:$36 sps:$4 sm:$0xff]  }
 0x11c   :  { %4258 = vmatpush1.bf16.msra.mxu0 %v6371_v12  ;;  %4463 = vmatpush1.bf16.msra.mxu1 %v6374_v14  ;;  %v6460_v12 = vld [vmem:[#allocation5 + $0xec] ss:$36 sps:$4 sm:$0xff]   ;;  %v6463_v14 = vld [vmem:[#allocation5 + $0xf4] ss:$36 sps:$4 sm:$0xff]  }
 0x11d   :  { %4259 = vmatprep.subr.bf16.mxu0 %v6379_v16  ;;  %4464 = vmatprep.subr.bf16.mxu1 %v6382_v17  ;;  %v6458_v16 = vld [vmem:[#allocation5 + $0xe8] ss:$36 sps:$4 sm:$0xff]   ;;  %v6461_v17 = vld [vmem:[#allocation5 + $0xf0] ss:$36 sps:$4 sm:$0xff]  }
 0x120   :  { %4260 = vmatpush1.bf16.msra.mxu0 %v6377_v18  ;;  %4465 = vmatpush1.bf16.msra.mxu1 %v6380_v21  ;;  %v6466_v18 = vld [vmem:[#allocation5 + $0x134] ss:$36 sps:$4 sm:$0xff]   ;;  %v6469_v21 = vld [vmem:[#allocation5 + $0x13c] ss:$36 sps:$4 sm:$0xff]  }
 0x121   :  { %4261 = vmatprep.subr.bf16.mxu0 %v6385_v22  ;;  %4466 = vmatprep.subr.bf16.mxu1 %v6388_v23  ;;  %v6464_v22 = vld [vmem:[#allocation5 + $0x130] ss:$36 sps:$4 sm:$0xff]   ;;  %v6467_v23 = vld [vmem:[#allocation5 + $0x138] ss:$36 sps:$4 sm:$0xff]  }
 0x124   :  { %4262 = vmatpush1.bf16.msra.mxu0 %v6383_v13  ;;  %4467 = vmatpush1.bf16.msra.mxu1 %v6386_v25  ;;  %v6472_v13 = vld [vmem:[#allocation5 + $0x17c] ss:$36 sps:$4 sm:$0xff]   ;;  %v6475_v25 = vld [vmem:[#allocation5 + $0x184] ss:$36 sps:$4 sm:$0xff]  }
 0x125   :  { %4272 = vmatprep.subr.bf16.mxu0 %v6392_v26  ;;  %4477 = vmatprep.subr.bf16.mxu1 %v6395_v27  ;;  %v6470_v26 = vld [vmem:[#allocation5 + $0x178] ss:$36 sps:$4 sm:$0xff]   ;;  %v6473_v27 = vld [vmem:[#allocation5 + $0x180] ss:$36 sps:$4 sm:$0xff]  }
 0x127   :  { %4264 = vmatmul.mubr.bf16.vlgmr.msra.gmra.mrb[0].mxu0 %v7117_v28  ;;  %4469 = vmatmul.mubr.bf16.vlgmr.msra.gmra.mrb[0].mxu1 %v7117_v28 }
 0x128   :  { %4273 = vmatpush1.bf16.msra.mxu0 %v6390_v29  ;;  %4478 = vmatpush1.bf16.msra.mxu1 %v6393_v31  ;;  %v6478_v29 = vld [vmem:[#allocation5 + $0x1c4] ss:$36 sps:$4 sm:$0xff]   ;;  %v6481_v31 = vld [vmem:[#allocation5 + $0x1cc] ss:$36 sps:$4 sm:$0xff]  }
 0x129   :  { %4274 = vmatprep.subr.bf16.mxu0 %v6399_v32  ;;  %4479 = vmatprep.subr.bf16.mxu1 %v6402_v33  ;;  %v6476_v32 = vld [vmem:[#allocation5 + $0x1c0] ss:$36 sps:$4 sm:$0xff]   ;;  %v6479_v33 = vld [vmem:[#allocation5 + $0x1c8] ss:$36 sps:$4 sm:$0xff]  }
 0x12a   :  { %4304 = vmatprep.mubr.bf16.mxu0 %v7021_v37  ;;  %4509 = vmatprep.mubr.bf16.mxu1 %v7021_v37 }
 0x12c   :  { %4275 = vmatpush1.bf16.msra.mxu0 %v6397_v34  ;;  %4480 = vmatpush1.bf16.msra.mxu1 %v6400_v35  ;;  %v6484_v34 = vld [vmem:[#allocation5 + $0x20c] ss:$36 sps:$4 sm:$0xff]   ;;  %v6487_v35 = vld [vmem:[#allocation5 + $0x214] ss:$36 sps:$4 sm:$0xff]  }
 0x12d   :  { %4276 = vmatprep.subr.bf16.mxu0 %v6405_v20  ;;  %4481 = vmatprep.subr.bf16.mxu1 %v6408_v36  ;;  %v6482_v20 = vld [vmem:[#allocation5 + $0x208] ss:$36 sps:$4 sm:$0xff]   ;;  %v6485_v36 = vld [vmem:[#allocation5 + $0x210] ss:$36 sps:$4 sm:$0xff]  }
 0x130   :  { %4277 = vmatpush1.bf16.msra.mxu0 %v6403_v38  ;;  %4482 = vmatpush1.bf16.msra.mxu1 %v6406_v39  ;;  %v6490_v38 = vld [vmem:[#allocation5 + $0x254] ss:$36 sps:$4 sm:$0xff]   ;;  %v6493_v39 = vld [vmem:[#allocation5 + $0x25c] ss:$36 sps:$4 sm:$0xff]  }
 0x131   :  { %4278 = vmatprep.subr.bf16.mxu0 %v6411_v40  ;;  %4483 = vmatprep.subr.bf16.mxu1 %v6414_v41  ;;  %v6488_v40 = vld [vmem:[#allocation5 + $0x250] ss:$36 sps:$4 sm:$0xff]   ;;  %v6491_v41 = vld [vmem:[#allocation5 + $0x258] ss:$36 sps:$4 sm:$0xff]  }
 0x134   :  { %4279 = vmatpush1.bf16.msra.mxu0 %v6409_v42  ;;  %4484 = vmatpush1.bf16.msra.mxu1 %v6412_v43  ;;  %v6496_v42 = vld [vmem:[#allocation5 + $0x29c] ss:$36 sps:$4 sm:$0xff]   ;;  %v6499_v43 = vld [vmem:[#allocation5 + $0x2a4] ss:$36 sps:$4 sm:$0xff]  }
 0x135   :  { %4280 = vmatprep.subr.bf16.mxu0 %v6417_v44  ;;  %4485 = vmatprep.subr.bf16.mxu1 %v6420_v45  ;;  %v6494_v44 = vld [vmem:[#allocation5 + $0x298] ss:$36 sps:$4 sm:$0xff]   ;;  %v6497_v45 = vld [vmem:[#allocation5 + $0x2a0] ss:$36 sps:$4 sm:$0xff]  }
 0x138   :  { %4281 = vmatpush1.bf16.msra.mxu0 %v6415_v46  ;;  %4486 = vmatpush1.bf16.msra.mxu1 %v6418_v47  ;;  %v6502_v46 = vld [vmem:[#allocation5 + $0x2e4] ss:$36 sps:$4 sm:$0xff]   ;;  %v6505_v47 = vld [vmem:[#allocation5 + $0x2ec] ss:$36 sps:$4 sm:$0xff]  }
 0x139   :  { %4282 = vmatprep.subr.bf16.mxu0 %v6423_v49  ;;  %4487 = vmatprep.subr.bf16.mxu1 %v6426_v50  ;;  %v6500_v49 = vld [vmem:[#allocation5 + $0x2e0] ss:$36 sps:$4 sm:$0xff]   ;;  %v6503_v50 = vld [vmem:[#allocation5 + $0x2e8] ss:$36 sps:$4 sm:$0xff]  }
 0x13c   :  { %4283 = vmatpush1.bf16.msra.mxu0 %v6421_v51  ;;  %4488 = vmatpush1.bf16.msra.mxu1 %v6424_v52  ;;  %v6508_v51 = vld [vmem:[#allocation5 + $0x32c] ss:$36 sps:$4 sm:$0xff]   ;;  %v6511_v52 = vld [vmem:[#allocation5 + $0x334] ss:$36 sps:$4 sm:$0xff]  }
 0x13d   :  { %4284 = vmatprep.subr.bf16.mxu0 %v6429_v53  ;;  %4489 = vmatprep.subr.bf16.mxu1 %v6432_v54  ;;  %v6506_v53 = vld [vmem:[#allocation5 + $0x328] ss:$36 sps:$4 sm:$0xff]   ;;  %v6509_v54 = vld [vmem:[#allocation5 + $0x330] ss:$36 sps:$4 sm:$0xff]  }
 0x140   :  { %4285 = vmatpush1.bf16.msra.mxu0 %v6427_v55  ;;  %4490 = vmatpush1.bf16.msra.mxu1 %v6430_v56  ;;  %v6514_v55 = vld [vmem:[#allocation5 + $0x374] ss:$36 sps:$4 sm:$0xff]   ;;  %v6517_v56 = vld [vmem:[#allocation5 + $0x37c] ss:$36 sps:$4 sm:$0xff]  }
 0x141   :  { %4286 = vmatprep.subr.bf16.mxu0 %v6435_v57  ;;  %4491 = vmatprep.subr.bf16.mxu1 %v6438_v58  ;;  %v6512_v57 = vld [vmem:[#allocation5 + $0x370] ss:$36 sps:$4 sm:$0xff]   ;;  %v6515_v58 = vld [vmem:[#allocation5 + $0x378] ss:$36 sps:$4 sm:$0xff]  }
 0x144   :  { %4287 = vmatpush1.bf16.msra.mxu0 %v6433_v59  ;;  %4492 = vmatpush1.bf16.msra.mxu1 %v6436_v60  ;;  %v6520_v59 = vld [vmem:[#allocation5 + $0x3bc] ss:$36 sps:$4 sm:$0xff]   ;;  %v6523_v60 = vld [vmem:[#allocation5 + $0x3c4] ss:$36 sps:$4 sm:$0xff]  }
 0x145   :  { %4518 = vmatprep.subr.bf16.mxu0 %v6442_v62  ;;  %4723 = vmatprep.subr.bf16.mxu1 %v6445_v63  ;;  %v6521_v62 = vld [vmem:[#allocation5 + $0x3c0] ss:$36 sps:$4 sm:$0xff]  }
 0x146   :  { %v6526_v63 = vld [vmem:[#allocation5 + $0x404] ss:$36 sps:$4 sm:$0xff]  }
 0x147   :  { %4305 = vmatmul.mubr.bf16.vlgmr.msra.gmra.mrb[0].mxu0 %v6439_v61  ;;  %4510 = vmatmul.mubr.bf16.vlgmr.msra.gmra.mrb[0].mxu1 %v6439_v61  ;;  %v6518_v61 = vld [vmem:[#allocation5 + $0x3b8] ss:$36 sps:$4 sm:$0xff]  }
 0x148   :  { %4519 = vmatpush1.bf16.msra.mxu0 %v6440_v0  ;;  %4724 = vmatpush1.bf16.msra.mxu1 %v6443_v1  ;;  %v6529_v0 = vld [vmem:[#allocation5 + $0x40c] ss:$36 sps:$4 sm:$0xff]   ;;  %v6524_v1 = vld [vmem:[#allocation5 + $0x400] ss:$36 sps:$4 sm:$0xff]  }
 0x149   :  { %4520 = vmatprep.subr.bf16.mxu0 %v6448_v2  ;;  %4725 = vmatprep.subr.bf16.mxu1 %v6451_v3  ;;  %v6527_v2 = vld [vmem:[#allocation5 + $0x408] ss:$36 sps:$4 sm:$0xff]  }
 0x14a   :  { %4550 = vmatprep.mubr.bf16.mxu0 %v7071_v48  ;;  %4755 = vmatprep.mubr.bf16.mxu1 %v7071_v48  ;;  %v6532_v3 = vld [vmem:[#allocation5 + $0x44c] ss:$36 sps:$4 sm:$0xff]  }
 0x14c   :  { %4521 = vmatpush1.bf16.msra.mxu0 %v6446_v4  ;;  %4726 = vmatpush1.bf16.msra.mxu1 %v6449_v6  ;;  %v6535_v4 = vld [vmem:[#allocation5 + $0x454] ss:$36 sps:$4 sm:$0xff]   ;;  %v6530_v6 = vld [vmem:[#allocation5 + $0x448] ss:$36 sps:$4 sm:$0xff]  }
 0x14d   :  { %4522 = vmatprep.subr.bf16.mxu0 %v6454_v7  ;;  %4727 = vmatprep.subr.bf16.mxu1 %v6457_v8  ;;  %v6533_v7 = vld [vmem:[#allocation5 + $0x450] ss:$36 sps:$4 sm:$0xff]  }
 0x14e   :  { %v6538_v8 = vld [vmem:[#allocation5 + $0x494] ss:$36 sps:$4 sm:$0xff]  }
 0x150   :  { %4523 = vmatpush1.bf16.msra.mxu0 %v6452_v9  ;;  %4728 = vmatpush1.bf16.msra.mxu1 %v6455_v11  ;;  %v6541_v9 = vld [vmem:[#allocation5 + $0x49c] ss:$36 sps:$4 sm:$0xff]   ;;  %v6536_v11 = vld [vmem:[#allocation5 + $0x490] ss:$36 sps:$4 sm:$0xff]  }
 0x151   :  { %4524 = vmatprep.subr.bf16.mxu0 %v6460_v12  ;;  %4729 = vmatprep.subr.bf16.mxu1 %v6463_v14  ;;  %v6539_v12 = vld [vmem:[#allocation5 + $0x498] ss:$36 sps:$4 sm:$0xff]  }
 0x152   :  { %v6544_v14 = vld [vmem:[#allocation5 + $0x4dc] ss:$36 sps:$4 sm:$0xff]  }
 0x154   :  { %4525 = vmatpush1.bf16.msra.mxu0 %v6458_v16  ;;  %4730 = vmatpush1.bf16.msra.mxu1 %v6461_v17  ;;  %v6547_v16 = vld [vmem:[#allocation5 + $0x4e4] ss:$36 sps:$4 sm:$0xff]   ;;  %v6542_v17 = vld [vmem:[#allocation5 + $0x4d8] ss:$36 sps:$4 sm:$0xff]  }
 0x155   :  { %4526 = vmatprep.subr.bf16.mxu0 %v6466_v18  ;;  %4731 = vmatprep.subr.bf16.mxu1 %v6469_v21  ;;  %v6545_v18 = vld [vmem:[#allocation5 + $0x4e0] ss:$36 sps:$4 sm:$0xff]  }
 0x156   :  { %v6550_v21 = vld [vmem:[#allocation5 + $0x524] ss:$36 sps:$4 sm:$0xff]  }
 0x158   :  { %4527 = vmatpush1.bf16.msra.mxu0 %v6464_v22  ;;  %4732 = vmatpush1.bf16.msra.mxu1 %v6467_v23  ;;  %v6553_v22 = vld [vmem:[#allocation5 + $0x52c] ss:$36 sps:$4 sm:$0xff]   ;;  %v6548_v23 = vld [vmem:[#allocation5 + $0x520] ss:$36 sps:$4 sm:$0xff]  }
 0x159   :  { %4528 = vmatprep.subr.bf16.mxu0 %v6472_v13  ;;  %4733 = vmatprep.subr.bf16.mxu1 %v6475_v25  ;;  %v6551_v13 = vld [vmem:[#allocation5 + $0x528] ss:$36 sps:$4 sm:$0xff]  }
 0x15a   :  { %v6556_v25 = vld [vmem:[#allocation5 + $0x56c] ss:$36 sps:$4 sm:$0xff]  }
 0x15c   :  { %4529 = vmatpush1.bf16.msra.mxu0 %v6470_v26  ;;  %4734 = vmatpush1.bf16.msra.mxu1 %v6473_v27  ;;  %v6559_v26 = vld [vmem:[#allocation5 + $0x574] ss:$36 sps:$4 sm:$0xff]   ;;  %v6554_v27 = vld [vmem:[#allocation5 + $0x568] ss:$36 sps:$4 sm:$0xff]  }
 0x15d   :  { %4530 = vmatprep.subr.bf16.mxu0 %v6478_v29  ;;  %4735 = vmatprep.subr.bf16.mxu1 %v6481_v31  ;;  %v6557_v29 = vld [vmem:[#allocation5 + $0x570] ss:$36 sps:$4 sm:$0xff]  }
 0x15e   :  { %v6562_v31 = vld [vmem:[#allocation5 + $0x5b4] ss:$36 sps:$4 sm:$0xff]  }
 0x160   :  { %4531 = vmatpush1.bf16.msra.mxu0 %v6476_v32  ;;  %4736 = vmatpush1.bf16.msra.mxu1 %v6479_v33  ;;  %v6565_v32 = vld [vmem:[#allocation5 + $0x5bc] ss:$36 sps:$4 sm:$0xff]   ;;  %v6560_v33 = vld [vmem:[#allocation5 + $0x5b0] ss:$36 sps:$4 sm:$0xff]  }
 0x161   :  { %4532 = vmatprep.subr.bf16.mxu0 %v6484_v34  ;;  %4737 = vmatprep.subr.bf16.mxu1 %v6487_v35  ;;  %v6563_v34 = vld [vmem:[#allocation5 + $0x5b8] ss:$36 sps:$4 sm:$0xff]  }
 0x162   :  { %v6568_v35 = vld [vmem:[#allocation5 + $0x5fc] ss:$36 sps:$4 sm:$0xff]  }
 0x164   :  { %4533 = vmatpush1.bf16.msra.mxu0 %v6482_v20  ;;  %4738 = vmatpush1.bf16.msra.mxu1 %v6485_v36  ;;  %v6571_v20 = vld [vmem:[#allocation5 + $0x604] ss:$36 sps:$4 sm:$0xff]   ;;  %v6566_v36 = vld [vmem:[#allocation5 + $0x5f8] ss:$36 sps:$4 sm:$0xff]  }
 0x165   :  { %4534 = vmatprep.subr.bf16.mxu0 %v6490_v38  ;;  %4739 = vmatprep.subr.bf16.mxu1 %v6493_v39  ;;  %v6569_v38 = vld [vmem:[#allocation5 + $0x600] ss:$36 sps:$4 sm:$0xff]  }
 0x166   :  { %v6574_v39 = vld [vmem:[#allocation5 + $0x644] ss:$36 sps:$4 sm:$0xff]  }
 0x168   :  { %4535 = vmatpush1.bf16.msra.mxu0 %v6488_v40  ;;  %4740 = vmatpush1.bf16.msra.mxu1 %v6491_v41  ;;  %v6577_v40 = vld [vmem:[#allocation5 + $0x64c] ss:$36 sps:$4 sm:$0xff]   ;;  %v6572_v41 = vld [vmem:[#allocation5 + $0x640] ss:$36 sps:$4 sm:$0xff]  }
 0x169   :  { %4536 = vmatprep.subr.bf16.mxu0 %v6496_v42  ;;  %4741 = vmatprep.subr.bf16.mxu1 %v6499_v43  ;;  %v6575_v42 = vld [vmem:[#allocation5 + $0x648] ss:$36 sps:$4 sm:$0xff]  }
 0x16a   :  { %v6580_v43 = vld [vmem:[#allocation5 + $0x68c] ss:$36 sps:$4 sm:$0xff]  }
 0x16c   :  { %4537 = vmatpush1.bf16.msra.mxu0 %v6494_v44  ;;  %4742 = vmatpush1.bf16.msra.mxu1 %v6497_v45  ;;  %v6583_v44 = vld [vmem:[#allocation5 + $0x694] ss:$36 sps:$4 sm:$0xff]   ;;  %v6578_v45 = vld [vmem:[#allocation5 + $0x688] ss:$36 sps:$4 sm:$0xff]  }
 0x16d   :  { %4538 = vmatprep.subr.bf16.mxu0 %v6502_v46  ;;  %4743 = vmatprep.subr.bf16.mxu1 %v6505_v47  ;;  %v6581_v46 = vld [vmem:[#allocation5 + $0x690] ss:$36 sps:$4 sm:$0xff]  }
 0x16e   :  { %v6586_v47 = vld [vmem:[#allocation5 + $0x6d4] ss:$36 sps:$4 sm:$0xff]  }
 0x170   :  { %4539 = vmatpush1.bf16.msra.mxu0 %v6500_v49  ;;  %4744 = vmatpush1.bf16.msra.mxu1 %v6503_v50  ;;  %v6589_v49 = vld [vmem:[#allocation5 + $0x6dc] ss:$36 sps:$4 sm:$0xff]   ;;  %v6584_v50 = vld [vmem:[#allocation5 + $0x6d0] ss:$36 sps:$4 sm:$0xff]  }
 0x171   :  { %4540 = vmatprep.subr.bf16.mxu0 %v6508_v51  ;;  %4745 = vmatprep.subr.bf16.mxu1 %v6511_v52  ;;  %v6587_v51 = vld [vmem:[#allocation5 + $0x6d8] ss:$36 sps:$4 sm:$0xff]  }
 0x172   :  { %v6592_v52 = vld [vmem:[#allocation5 + $0x71c] ss:$36 sps:$4 sm:$0xff]  }
 0x174   :  { %4541 = vmatpush1.bf16.msra.mxu0 %v6506_v53  ;;  %4746 = vmatpush1.bf16.msra.mxu1 %v6509_v54  ;;  %v6595_v53 = vld [vmem:[#allocation5 + $0x724] ss:$36 sps:$4 sm:$0xff]   ;;  %v6590_v54 = vld [vmem:[#allocation5 + $0x718] ss:$36 sps:$4 sm:$0xff]  }
 0x175   :  { %4542 = vmatprep.subr.bf16.mxu0 %v6514_v55  ;;  %4747 = vmatprep.subr.bf16.mxu1 %v6517_v56  ;;  %v6593_v55 = vld [vmem:[#allocation5 + $0x720] ss:$36 sps:$4 sm:$0xff]  }
 0x176   :  { %v6598_v56 = vld [vmem:[#allocation5 + $0x764] ss:$36 sps:$4 sm:$0xff]  }
 0x178   :  { %4543 = vmatpush1.bf16.msra.mxu0 %v6512_v57  ;;  %4748 = vmatpush1.bf16.msra.mxu1 %v6515_v58  ;;  %v6601_v57 = vld [vmem:[#allocation5 + $0x76c] ss:$36 sps:$4 sm:$0xff]   ;;  %v6596_v58 = vld [vmem:[#allocation5 + $0x760] ss:$36 sps:$4 sm:$0xff]  }
 0x179   :  { %4544 = vmatprep.subr.bf16.mxu0 %v6520_v59  ;;  %4749 = vmatprep.subr.bf16.mxu1 %v6523_v60  ;;  %v6599_v59 = vld [vmem:[#allocation5 + $0x768] ss:$36 sps:$4 sm:$0xff]  }
 0x17a   :  { %v6604_v60 = vld [vmem:[#allocation5 + $0x7ac] ss:$36 sps:$4 sm:$0xff]  }
 0x17c   :  { %4545 = vmatpush1.bf16.msra.mxu0 %v6518_v61  ;;  %4750 = vmatpush1.bf16.msra.mxu1 %v6521_v62  ;;  %v6607_v61 = vld [vmem:[#allocation5 + $0x7b4] ss:$36 sps:$4 sm:$0xff]   ;;  %v6602_v62 = vld [vmem:[#allocation5 + $0x7a8] ss:$36 sps:$4 sm:$0xff]  }
 0x17d   :  { %4546 = vmatprep.subr.bf16.mxu0 %v6526_v63  ;;  %4751 = vmatprep.subr.bf16.mxu1 %v6529_v0  ;;  %v6605_v63 = vld [vmem:[#allocation5 + $0x7b0] ss:$36 sps:$4 sm:$0xff]  }
 0x17e   :  { %v6610_v0 = vld [vmem:[#allocation5 + $0x7f4] ss:$36 sps:$4 sm:$0xff]  }
 0x180   :  { %4547 = vmatpush1.bf16.msra.mxu0 %v6524_v1  ;;  %4752 = vmatpush1.bf16.msra.mxu1 %v6527_v2  ;;  %v6613_v1 = vld [vmem:[#allocation5 + $0x7fc] ss:$36 sps:$4 sm:$0xff]   ;;  %v6608_v2 = vld [vmem:[#allocation5 + $0x7f0] ss:$36 sps:$4 sm:$0xff]  }
 0x181   :  { %4548 = vmatprep.subr.bf16.mxu0 %v6532_v3  ;;  %4753 = vmatprep.subr.bf16.mxu1 %v6535_v4  ;;  %v6611_v3 = vld [vmem:[#allocation5 + $0x7f8] ss:$36 sps:$4 sm:$0xff]  }
 0x182   :  { %v6616_v4 = vld [vmem:[#allocation5 + $0x83c] ss:$36 sps:$4 sm:$0xff]  }
 0x184   :  { %4549 = vmatpush1.bf16.msra.mxu0 %v6530_v6  ;;  %4754 = vmatpush1.bf16.msra.mxu1 %v6533_v7  ;;  %v6619_v6 = vld [vmem:[#allocation5 + $0x844] ss:$36 sps:$4 sm:$0xff]   ;;  %v6614_v7 = vld [vmem:[#allocation5 + $0x838] ss:$36 sps:$4 sm:$0xff]  }
 0x185   :  { %4559 = vmatprep.subr.bf16.mxu0 %v6538_v8  ;;  %4764 = vmatprep.subr.bf16.mxu1 %v6541_v9  ;;  %v6617_v8 = vld [vmem:[#allocation5 + $0x840] ss:$36 sps:$4 sm:$0xff]  }
 0x186   :  { %v6622_v9 = vld [vmem:[#allocation5 + $0x884] ss:$36 sps:$4 sm:$0xff]  }
 0x187   :  { %4551 = vmatmul.mubr.bf16.vlgmr.msra.gmra.mrb[4].mxu0 %v7075_v5  ;;  %4756 = vmatmul.mubr.bf16.vlgmr.msra.gmra.mrb[4].mxu1 %v7075_v5 }
 0x188   :  { %4560 = vmatpush1.bf16.msra.mxu0 %v6536_v11  ;;  %4765 = vmatpush1.bf16.msra.mxu1 %v6539_v12  ;;  %v6625_v11 = vld [vmem:[#allocation5 + $0x88c] ss:$36 sps:$4 sm:$0xff]   ;;  %v6620_v12 = vld [vmem:[#allocation5 + $0x880] ss:$36 sps:$4 sm:$0xff]  }
 0x189   :  { %4561 = vmatprep.subr.bf16.mxu0 %v6544_v14  ;;  %4766 = vmatprep.subr.bf16.mxu1 %v6547_v16  ;;  %v6623_v14 = vld [vmem:[#allocation5 + $0x888] ss:$36 sps:$4 sm:$0xff]  }
 0x18a   :  { %4591 = vmatprep.mubr.bf16.mxu0 %v7083_v30  ;;  %4796 = vmatprep.mubr.bf16.mxu1 %v7083_v30  ;;  %v6628_v16 = vld [vmem:[#allocation5 + $0x8cc] ss:$36 sps:$4 sm:$0xff]  }
 0x18c   :  { %4562 = vmatpush1.bf16.msra.mxu0 %v6542_v17  ;;  %4767 = vmatpush1.bf16.msra.mxu1 %v6545_v18  ;;  %v6631_v17 = vld [vmem:[#allocation5 + $0x8d4] ss:$36 sps:$4 sm:$0xff]   ;;  %v6626_v18 = vld [vmem:[#allocation5 + $0x8c8] ss:$36 sps:$4 sm:$0xff]  }
 0x18d   :  { %4563 = vmatprep.subr.bf16.mxu0 %v6550_v21  ;;  %4768 = vmatprep.subr.bf16.mxu1 %v6553_v22  ;;  %v6629_v21 = vld [vmem:[#allocation5 + $0x8d0] ss:$36 sps:$4 sm:$0xff]  }
 0x18e   :  { %v6634_v22 = vld [vmem:[#allocation5 + $0x914] ss:$36 sps:$4 sm:$0xff]  }
 0x190   :  { %4564 = vmatpush1.bf16.msra.mxu0 %v6548_v23  ;;  %4769 = vmatpush1.bf16.msra.mxu1 %v6551_v13  ;;  %v6637_v23 = vld [vmem:[#allocation5 + $0x91c] ss:$36 sps:$4 sm:$0xff]   ;;  %v6632_v13 = vld [vmem:[#allocation5 + $0x910] ss:$36 sps:$4 sm:$0xff]  }
 0x191   :  { %4565 = vmatprep.subr.bf16.mxu0 %v6556_v25  ;;  %4770 = vmatprep.subr.bf16.mxu1 %v6559_v26  ;;  %v6635_v25 = vld [vmem:[#allocation5 + $0x918] ss:$36 sps:$4 sm:$0xff]  }
 0x192   :  { %v6640_v26 = vld [vmem:[#allocation5 + $0x95c] ss:$36 sps:$4 sm:$0xff]  }
 0x194   :  { %4566 = vmatpush1.bf16.msra.mxu0 %v6554_v27  ;;  %4771 = vmatpush1.bf16.msra.mxu1 %v6557_v29  ;;  %v6643_v27 = vld [vmem:[#allocation5 + $0x964] ss:$36 sps:$4 sm:$0xff]   ;;  %v6638_v29 = vld [vmem:[#allocation5 + $0x958] ss:$36 sps:$4 sm:$0xff]  }
 0x195   :  { %4567 = vmatprep.subr.bf16.mxu0 %v6562_v31  ;;  %4772 = vmatprep.subr.bf16.mxu1 %v6565_v32  ;;  %v6641_v31 = vld [vmem:[#allocation5 + $0x960] ss:$36 sps:$4 sm:$0xff]  }
 0x196   :  { %v6646_v32 = vld [vmem:[#allocation5 + $0x9a4] ss:$36 sps:$4 sm:$0xff]  }
 0x198   :  { %4568 = vmatpush1.bf16.msra.mxu0 %v6560_v33  ;;  %4773 = vmatpush1.bf16.msra.mxu1 %v6563_v34  ;;  %v6649_v33 = vld [vmem:[#allocation5 + $0x9ac] ss:$36 sps:$4 sm:$0xff]   ;;  %v6644_v34 = vld [vmem:[#allocation5 + $0x9a0] ss:$36 sps:$4 sm:$0xff]  }
 0x199   :  { %4569 = vmatprep.subr.bf16.mxu0 %v6568_v35  ;;  %4774 = vmatprep.subr.bf16.mxu1 %v6571_v20  ;;  %v6647_v35 = vld [vmem:[#allocation5 + $0x9a8] ss:$36 sps:$4 sm:$0xff]  }
 0x19a   :  { %v6652_v20 = vld [vmem:[#allocation5 + $0x9ec] ss:$36 sps:$4 sm:$0xff]  }
 0x19c   :  { %4570 = vmatpush1.bf16.msra.mxu0 %v6566_v36  ;;  %4775 = vmatpush1.bf16.msra.mxu1 %v6569_v38  ;;  %v6655_v36 = vld [vmem:[#allocation5 + $0x9f4] ss:$36 sps:$4 sm:$0xff]   ;;  %v6650_v38 = vld [vmem:[#allocation5 + $0x9e8] ss:$36 sps:$4 sm:$0xff]  }
 0x19d   :  { %4571 = vmatprep.subr.bf16.mxu0 %v6574_v39  ;;  %4776 = vmatprep.subr.bf16.mxu1 %v6577_v40  ;;  %v6653_v39 = vld [vmem:[#allocation5 + $0x9f0] ss:$36 sps:$4 sm:$0xff]  }
 0x19e   :  { %v6658_v40 = vld [vmem:[#allocation5 + $0xa34] ss:$36 sps:$4 sm:$0xff]  }
 0x1a0   :  { %4572 = vmatpush1.bf16.msra.mxu0 %v6572_v41  ;;  %4777 = vmatpush1.bf16.msra.mxu1 %v6575_v42  ;;  %v6661_v41 = vld [vmem:[#allocation5 + $0xa3c] ss:$36 sps:$4 sm:$0xff]   ;;  %v6656_v42 = vld [vmem:[#allocation5 + $0xa30] ss:$36 sps:$4 sm:$0xff]  }
 0x1a1   :  { %4573 = vmatprep.subr.bf16.mxu0 %v6580_v43  ;;  %4778 = vmatprep.subr.bf16.mxu1 %v6583_v44  ;;  %v6659_v43 = vld [vmem:[#allocation5 + $0xa38] ss:$36 sps:$4 sm:$0xff]  }
 0x1a2   :  { %v6664_v44 = vld [vmem:[#allocation5 + $0xa7c] ss:$36 sps:$4 sm:$0xff]  }
 0x1a4   :  { %4574 = vmatpush1.bf16.msra.mxu0 %v6578_v45  ;;  %4779 = vmatpush1.bf16.msra.mxu1 %v6581_v46  ;;  %v6667_v45 = vld [vmem:[#allocation5 + $0xa84] ss:$36 sps:$4 sm:$0xff]   ;;  %v6662_v46 = vld [vmem:[#allocation5 + $0xa78] ss:$36 sps:$4 sm:$0xff]  }
 0x1a5   :  { %4575 = vmatprep.subr.bf16.mxu0 %v6586_v47  ;;  %4780 = vmatprep.subr.bf16.mxu1 %v6589_v49  ;;  %v6665_v47 = vld [vmem:[#allocation5 + $0xa80] ss:$36 sps:$4 sm:$0xff]  }
 0x1a6   :  { %v6670_v49 = vld [vmem:[#allocation5 + $0xac4] ss:$36 sps:$4 sm:$0xff]  }
 0x1a8   :  { %4576 = vmatpush1.bf16.msra.mxu0 %v6584_v50  ;;  %4781 = vmatpush1.bf16.msra.mxu1 %v6587_v51  ;;  %v6673_v50 = vld [vmem:[#allocation5 + $0xacc] ss:$36 sps:$4 sm:$0xff]   ;;  %v6668_v51 = vld [vmem:[#allocation5 + $0xac0] ss:$36 sps:$4 sm:$0xff]  }
 0x1a9   :  { %4577 = vmatprep.subr.bf16.mxu0 %v6592_v52  ;;  %4782 = vmatprep.subr.bf16.mxu1 %v6595_v53  ;;  %v6671_v52 = vld [vmem:[#allocation5 + $0xac8] ss:$36 sps:$4 sm:$0xff]  }
 0x1aa   :  { %v6676_v53 = vld [vmem:[#allocation5 + $0xb0c] ss:$36 sps:$4 sm:$0xff]  }
 0x1ac   :  { %4578 = vmatpush1.bf16.msra.mxu0 %v6590_v54  ;;  %4783 = vmatpush1.bf16.msra.mxu1 %v6593_v55  ;;  %v6679_v54 = vld [vmem:[#allocation5 + $0xb14] ss:$36 sps:$4 sm:$0xff]   ;;  %v6674_v55 = vld [vmem:[#allocation5 + $0xb08] ss:$36 sps:$4 sm:$0xff]  }
 0x1ad   :  { %4579 = vmatprep.subr.bf16.mxu0 %v6598_v56  ;;  %4784 = vmatprep.subr.bf16.mxu1 %v6601_v57  ;;  %v6677_v56 = vld [vmem:[#allocation5 + $0xb10] ss:$36 sps:$4 sm:$0xff]  }
 0x1ae   :  { %v6682_v57 = vld [vmem:[#allocation5 + $0xb54] ss:$36 sps:$4 sm:$0xff]  }
 0x1b0   :  { %4580 = vmatpush1.bf16.msra.mxu0 %v6596_v58  ;;  %4785 = vmatpush1.bf16.msra.mxu1 %v6599_v59  ;;  %v6685_v58 = vld [vmem:[#allocation5 + $0xb5c] ss:$36 sps:$4 sm:$0xff]   ;;  %v6680_v59 = vld [vmem:[#allocation5 + $0xb50] ss:$36 sps:$4 sm:$0xff]  }
 0x1b1   :  { %4581 = vmatprep.subr.bf16.mxu0 %v6604_v60  ;;  %4786 = vmatprep.subr.bf16.mxu1 %v6607_v61  ;;  %v6683_v60 = vld [vmem:[#allocation5 + $0xb58] ss:$36 sps:$4 sm:$0xff]  }
 0x1b2   :  { %v6688_v61 = vld [vmem:[#allocation5 + $0xb9c] ss:$36 sps:$4 sm:$0xff]  }
 0x1b4   :  { %4582 = vmatpush1.bf16.msra.mxu0 %v6602_v62  ;;  %4787 = vmatpush1.bf16.msra.mxu1 %v6605_v63  ;;  %v6691_v62 = vld [vmem:[#allocation5 + $0xba4] ss:$36 sps:$4 sm:$0xff]   ;;  %v6686_v63 = vld [vmem:[#allocation5 + $0xb98] ss:$36 sps:$4 sm:$0xff]  }
 0x1b5   :  { %4583 = vmatprep.subr.bf16.mxu0 %v6610_v0  ;;  %4788 = vmatprep.subr.bf16.mxu1 %v6613_v1  ;;  %v6689_v0 = vld [vmem:[#allocation5 + $0xba0] ss:$36 sps:$4 sm:$0xff]  }
 0x1b6   :  { %v6694_v1 = vld [vmem:[#allocation5 + $0xbe4] ss:$36 sps:$4 sm:$0xff]  }
 0x1b8   :  { %4584 = vmatpush1.bf16.msra.mxu0 %v6608_v2  ;;  %4789 = vmatpush1.bf16.msra.mxu1 %v6611_v3  ;;  %v6697_v2 = vld [vmem:[#allocation5 + $0xbec] ss:$36 sps:$4 sm:$0xff]   ;;  %v6692_v3 = vld [vmem:[#allocation5 + $0xbe0] ss:$36 sps:$4 sm:$0xff]  }
 0x1b9   :  { %4585 = vmatprep.subr.bf16.mxu0 %v6616_v4  ;;  %4790 = vmatprep.subr.bf16.mxu1 %v6619_v6  ;;  %v6695_v4 = vld [vmem:[#allocation5 + $0xbe8] ss:$36 sps:$4 sm:$0xff]  }
 0x1ba   :  { %v6700_v6 = vld [vmem:[#allocation5 + $0xc2c] ss:$36 sps:$4 sm:$0xff]  }
 0x1bc   :  { %4586 = vmatpush1.bf16.msra.mxu0 %v6614_v7  ;;  %4791 = vmatpush1.bf16.msra.mxu1 %v6617_v8  ;;  %v6703_v7 = vld [vmem:[#allocation5 + $0xc34] ss:$36 sps:$4 sm:$0xff]   ;;  %v6698_v8 = vld [vmem:[#allocation5 + $0xc28] ss:$36 sps:$4 sm:$0xff]  }
 0x1bd   :  { %4587 = vmatprep.subr.bf16.mxu0 %v6622_v9  ;;  %4792 = vmatprep.subr.bf16.mxu1 %v6625_v11  ;;  %v6701_v9 = vld [vmem:[#allocation5 + $0xc30] ss:$36 sps:$4 sm:$0xff]  }
 0x1be   :  { %v6706_v11 = vld [vmem:[#allocation5 + $0xc74] ss:$36 sps:$4 sm:$0xff]  }
 0x1c0   :  { %4588 = vmatpush1.bf16.msra.mxu0 %v6620_v12  ;;  %4793 = vmatpush1.bf16.msra.mxu1 %v6623_v14  ;;  %v6709_v12 = vld [vmem:[#allocation5 + $0xc7c] ss:$36 sps:$4 sm:$0xff]   ;;  %v6704_v14 = vld [vmem:[#allocation5 + $0xc70] ss:$36 sps:$4 sm:$0xff]  }
 0x1c1   :  { %4589 = vmatprep.subr.bf16.mxu0 %v6628_v16  ;;  %4794 = vmatprep.subr.bf16.mxu1 %v6631_v17  ;;  %v6707_v16 = vld [vmem:[#allocation5 + $0xc78] ss:$36 sps:$4 sm:$0xff]  }
 0x1c2   :  { %v6712_v17 = vld [vmem:[#allocation5 + $0xcbc] ss:$36 sps:$4 sm:$0xff]  }
 0x1c4   :  { %4590 = vmatpush1.bf16.msra.mxu0 %v6626_v18  ;;  %4795 = vmatpush1.bf16.msra.mxu1 %v6629_v21  ;;  %v6715_v18 = vld [vmem:[#allocation5 + $0xcc4] ss:$36 sps:$4 sm:$0xff]   ;;  %v6710_v21 = vld [vmem:[#allocation5 + $0xcb8] ss:$36 sps:$4 sm:$0xff]  }
 0x1c5   :  { %4600 = vmatprep.subr.bf16.mxu0 %v6634_v22  ;;  %4805 = vmatprep.subr.bf16.mxu1 %v6637_v23  ;;  %v6713_v22 = vld [vmem:[#allocation5 + $0xcc0] ss:$36 sps:$4 sm:$0xff]  }
 0x1c6   :  { %v6718_v23 = vld [vmem:[#allocation5 + $0xd04] ss:$36 sps:$4 sm:$0xff]  }
 0x1c7   :  { %4592 = vmatmul.mubr.bf16.vlgmr.msra.gmra.mrb[4].mxu0 %v7089_v10  ;;  %4797 = vmatmul.mubr.bf16.vlgmr.msra.gmra.mrb[4].mxu1 %v7089_v10 }
 0x1c8   :  { %4601 = vmatpush1.bf16.msra.mxu0 %v6632_v13  ;;  %4806 = vmatpush1.bf16.msra.mxu1 %v6635_v25  ;;  %v6721_v13 = vld [vmem:[#allocation5 + $0xd0c] ss:$36 sps:$4 sm:$0xff]   ;;  %v6716_v25 = vld [vmem:[#allocation5 + $0xd00] ss:$36 sps:$4 sm:$0xff]  }
 0x1c9   :  { %4602 = vmatprep.subr.bf16.mxu0 %v6640_v26  ;;  %4807 = vmatprep.subr.bf16.mxu1 %v6643_v27  ;;  %v6719_v26 = vld [vmem:[#allocation5 + $0xd08] ss:$36 sps:$4 sm:$0xff]  }
 0x1ca   :  { %4632 = vmatprep.mubr.bf16.mxu0 %v7095_v15  ;;  %4837 = vmatprep.mubr.bf16.mxu1 %v7095_v15  ;;  %v6724_v27 = vld [vmem:[#allocation5 + $0xd4c] ss:$36 sps:$4 sm:$0xff]  }
 0x1cc   :  { %4603 = vmatpush1.bf16.msra.mxu0 %v6638_v29  ;;  %4808 = vmatpush1.bf16.msra.mxu1 %v6641_v31  ;;  %v6727_v29 = vld [vmem:[#allocation5 + $0xd54] ss:$36 sps:$4 sm:$0xff]   ;;  %v6722_v31 = vld [vmem:[#allocation5 + $0xd48] ss:$36 sps:$4 sm:$0xff]  }
 0x1cd   :  { %4604 = vmatprep.subr.bf16.mxu0 %v6646_v32  ;;  %4809 = vmatprep.subr.bf16.mxu1 %v6649_v33  ;;  %v6725_v32 = vld [vmem:[#allocation5 + $0xd50] ss:$36 sps:$4 sm:$0xff]  }
 0x1ce   :  { %v6730_v33 = vld [vmem:[#allocation5 + $0xd94] ss:$36 sps:$4 sm:$0xff]  }
 0x1d0   :  { %4605 = vmatpush1.bf16.msra.mxu0 %v6644_v34  ;;  %4810 = vmatpush1.bf16.msra.mxu1 %v6647_v35  ;;  %v6733_v34 = vld [vmem:[#allocation5 + $0xd9c] ss:$36 sps:$4 sm:$0xff]   ;;  %v6728_v35 = vld [vmem:[#allocation5 + $0xd90] ss:$36 sps:$4 sm:$0xff]  }
 0x1d1   :  { %4606 = vmatprep.subr.bf16.mxu0 %v6652_v20  ;;  %4811 = vmatprep.subr.bf16.mxu1 %v6655_v36  ;;  %v6731_v20 = vld [vmem:[#allocation5 + $0xd98] ss:$36 sps:$4 sm:$0xff]  }
 0x1d2   :  { %v6736_v36 = vld [vmem:[#allocation5 + $0xddc] ss:$36 sps:$4 sm:$0xff]  }
 0x1d4   :  { %4607 = vmatpush1.bf16.msra.mxu0 %v6650_v38  ;;  %4812 = vmatpush1.bf16.msra.mxu1 %v6653_v39  ;;  %v6739_v38 = vld [vmem:[#allocation5 + $0xde4] ss:$36 sps:$4 sm:$0xff]   ;;  %v6734_v39 = vld [vmem:[#allocation5 + $0xdd8] ss:$36 sps:$4 sm:$0xff]  }
 0x1d5   :  { %4608 = vmatprep.subr.bf16.mxu0 %v6658_v40  ;;  %4813 = vmatprep.subr.bf16.mxu1 %v6661_v41  ;;  %v6737_v40 = vld [vmem:[#allocation5 + $0xde0] ss:$36 sps:$4 sm:$0xff]  }
 0x1d6   :  { %v6742_v41 = vld [vmem:[#allocation5 + $0xe24] ss:$36 sps:$4 sm:$0xff]  }
 0x1d8   :  { %4609 = vmatpush1.bf16.msra.mxu0 %v6656_v42  ;;  %4814 = vmatpush1.bf16.msra.mxu1 %v6659_v43  ;;  %v6745_v42 = vld [vmem:[#allocation5 + $0xe2c] ss:$36 sps:$4 sm:$0xff]   ;;  %v6740_v43 = vld [vmem:[#allocation5 + $0xe20] ss:$36 sps:$4 sm:$0xff]  }
 0x1d9   :  { %4610 = vmatprep.subr.bf16.mxu0 %v6664_v44  ;;  %4815 = vmatprep.subr.bf16.mxu1 %v6667_v45  ;;  %v6743_v44 = vld [vmem:[#allocation5 + $0xe28] ss:$36 sps:$4 sm:$0xff]  }
 0x1da   :  { %v6748_v45 = vld [vmem:[#allocation5 + $0xe6c] ss:$36 sps:$4 sm:$0xff]  }
 0x1dc   :  { %4611 = vmatpush1.bf16.msra.mxu0 %v6662_v46  ;;  %4816 = vmatpush1.bf16.msra.mxu1 %v6665_v47  ;;  %v6751_v46 = vld [vmem:[#allocation5 + $0xe74] ss:$36 sps:$4 sm:$0xff]   ;;  %v6746_v47 = vld [vmem:[#allocation5 + $0xe68] ss:$36 sps:$4 sm:$0xff]  }
 0x1dd   :  { %4612 = vmatprep.subr.bf16.mxu0 %v6670_v49  ;;  %4817 = vmatprep.subr.bf16.mxu1 %v6673_v50  ;;  %v6749_v49 = vld [vmem:[#allocation5 + $0xe70] ss:$36 sps:$4 sm:$0xff]  }
 0x1de   :  { %v6754_v50 = vld [vmem:[#allocation5 + $0xeb4] ss:$36 sps:$4 sm:$0xff]  }
 0x1e0   :  { %4613 = vmatpush1.bf16.msra.mxu0 %v6668_v51  ;;  %4818 = vmatpush1.bf16.msra.mxu1 %v6671_v52  ;;  %v6757_v51 = vld [vmem:[#allocation5 + $0xebc] ss:$36 sps:$4 sm:$0xff]   ;;  %v6752_v52 = vld [vmem:[#allocation5 + $0xeb0] ss:$36 sps:$4 sm:$0xff]  }
 0x1e1   :  { %4614 = vmatprep.subr.bf16.mxu0 %v6676_v53  ;;  %4819 = vmatprep.subr.bf16.mxu1 %v6679_v54  ;;  %v6755_v53 = vld [vmem:[#allocation5 + $0xeb8] ss:$36 sps:$4 sm:$0xff]  }
 0x1e2   :  { %v6760_v54 = vld [vmem:[#allocation5 + $0xefc] ss:$36 sps:$4 sm:$0xff]  }
 0x1e4   :  { %4615 = vmatpush1.bf16.msra.mxu0 %v6674_v55  ;;  %4820 = vmatpush1.bf16.msra.mxu1 %v6677_v56  ;;  %v6763_v55 = vld [vmem:[#allocation5 + $0xf04] ss:$36 sps:$4 sm:$0xff]   ;;  %v6758_v56 = vld [vmem:[#allocation5 + $0xef8] ss:$36 sps:$4 sm:$0xff]  }
 0x1e5   :  { %4616 = vmatprep.subr.bf16.mxu0 %v6682_v57  ;;  %4821 = vmatprep.subr.bf16.mxu1 %v6685_v58  ;;  %v6761_v57 = vld [vmem:[#allocation5 + $0xf00] ss:$36 sps:$4 sm:$0xff]  }
 0x1e6   :  { %v6766_v58 = vld [vmem:[#allocation5 + $0xf44] ss:$36 sps:$4 sm:$0xff]  }
 0x1e8   :  { %4617 = vmatpush1.bf16.msra.mxu0 %v6680_v59  ;;  %4822 = vmatpush1.bf16.msra.mxu1 %v6683_v60  ;;  %v6769_v59 = vld [vmem:[#allocation5 + $0xf4c] ss:$36 sps:$4 sm:$0xff]  }
 0x1e9   :  { %4618 = vmatprep.subr.bf16.mxu0 %v6688_v61  ;;  %4823 = vmatprep.subr.bf16.mxu1 %v6691_v62 }
 0x1ec   :  { %4619 = vmatpush1.bf16.msra.mxu0 %v6686_v63  ;;  %4824 = vmatpush1.bf16.msra.mxu1 %v6689_v0 }
 0x1ed   :  { %4620 = vmatprep.subr.bf16.mxu0 %v6694_v1  ;;  %4825 = vmatprep.subr.bf16.mxu1 %v6697_v2  ;;  %v6764_v2 = vld [vmem:[#allocation5 + $0xf40] ss:$36 sps:$4 sm:$0xff]  }
 0x1f0   :  { %4621 = vmatpush1.bf16.msra.mxu0 %v6692_v3  ;;  %4826 = vmatpush1.bf16.msra.mxu1 %v6695_v4  ;;  %v6767_v3 = vld [vmem:[#allocation5 + $0xf48] ss:$36 sps:$4 sm:$0xff]  }
 0x1f1   :  { %4622 = vmatprep.subr.bf16.mxu0 %v6700_v6  ;;  %4827 = vmatprep.subr.bf16.mxu1 %v6703_v7  ;;  %v6772_v7 = vld [vmem:[#allocation5 + $0xf8c] ss:$36 sps:$4 sm:$0xff]  }
 0x1f4   :  { %4623 = vmatpush1.bf16.msra.mxu0 %v6698_v8  ;;  %4828 = vmatpush1.bf16.msra.mxu1 %v6701_v9  ;;  %v6775_v8 = vld [vmem:[#allocation5 + $0xf94] ss:$36 sps:$4 sm:$0xff]   ;;  %v6770_v9 = vld [vmem:[#allocation5 + $0xf88] ss:$36 sps:$4 sm:$0xff]  }
 0x1f5   :  { %4624 = vmatprep.subr.bf16.mxu0 %v6706_v11  ;;  %4829 = vmatprep.subr.bf16.mxu1 %v6709_v12  ;;  %v6773_v11 = vld [vmem:[#allocation5 + $0xf90] ss:$36 sps:$4 sm:$0xff]  }
 0x1f6   :  { %v6778_v12 = vld [vmem:[#allocation5 + $0xfd4] ss:$36 sps:$4 sm:$0xff]  }
 0x1f8   :  { %4625 = vmatpush1.bf16.msra.mxu0 %v6704_v14  ;;  %4830 = vmatpush1.bf16.msra.mxu1 %v6707_v16  ;;  %v6781_v14 = vld [vmem:[#allocation5 + $0xfdc] ss:$36 sps:$4 sm:$0xff]   ;;  %v6776_v16 = vld [vmem:[#allocation5 + $0xfd0] ss:$36 sps:$4 sm:$0xff]  }
 0x1f9   :  { %4626 = vmatprep.subr.bf16.mxu0 %v6712_v17  ;;  %4831 = vmatprep.subr.bf16.mxu1 %v6715_v18  ;;  %v6779_v17 = vld [vmem:[#allocation5 + $0xfd8] ss:$36 sps:$4 sm:$0xff]  }
 0x1fa   :  { %v6784_v18 = vld [vmem:[#allocation5 + $0x101c] ss:$36 sps:$4 sm:$0xff]  }
 0x1fc   :  { %4627 = vmatpush1.bf16.msra.mxu0 %v6710_v21  ;;  %4832 = vmatpush1.bf16.msra.mxu1 %v6713_v22  ;;  %v6787_v21 = vld [vmem:[#allocation5 + $0x1024] ss:$36 sps:$4 sm:$0xff]   ;;  %v6782_v22 = vld [vmem:[#allocation5 + $0x1018] ss:$36 sps:$4 sm:$0xff]  }
 0x1fd   :  { %4628 = vmatprep.subr.bf16.mxu0 %v6718_v23  ;;  %4833 = vmatprep.subr.bf16.mxu1 %v6721_v13  ;;  %v6785_v23 = vld [vmem:[#allocation5 + $0x1020] ss:$36 sps:$4 sm:$0xff]  }
 0x1fe   :  { %v6790_v13 = vld [vmem:[#allocation5 + $0x1064] ss:$36 sps:$4 sm:$0xff]  }
 0x200   :  { %4629 = vmatpush1.bf16.msra.mxu0 %v6716_v25  ;;  %4834 = vmatpush1.bf16.msra.mxu1 %v6719_v26  ;;  %v6793_v25 = vld [vmem:[#allocation5 + $0x106c] ss:$36 sps:$4 sm:$0xff]   ;;  %v6788_v26 = vld [vmem:[#allocation5 + $0x1060] ss:$36 sps:$4 sm:$0xff]  }
 0x201   :  { %4630 = vmatprep.subr.bf16.mxu0 %v6724_v27  ;;  %4835 = vmatprep.subr.bf16.mxu1 %v6727_v29  ;;  %v6791_v27 = vld [vmem:[#allocation5 + $0x1068] ss:$36 sps:$4 sm:$0xff]  }
 0x202   :  { %v6796_v29 = vld [vmem:[#allocation5 + $0x10ac] ss:$36 sps:$4 sm:$0xff]  }
 0x204   :  { %4631 = vmatpush1.bf16.msra.mxu0 %v6722_v31  ;;  %4836 = vmatpush1.bf16.msra.mxu1 %v6725_v32  ;;  %v6799_v31 = vld [vmem:[#allocation5 + $0x10b4] ss:$36 sps:$4 sm:$0xff]   ;;  %v6794_v32 = vld [vmem:[#allocation5 + $0x10a8] ss:$36 sps:$4 sm:$0xff]  }
 0x205   :  { %4641 = vmatprep.subr.bf16.mxu0 %v6730_v33  ;;  %4846 = vmatprep.subr.bf16.mxu1 %v6733_v34  ;;  %v6797_v33 = vld [vmem:[#allocation5 + $0x10b0] ss:$36 sps:$4 sm:$0xff]  }
 0x206   :  { %v6802_v34 = vld [vmem:[#allocation5 + $0x10f4] ss:$36 sps:$4 sm:$0xff]  }
 0x207   :  { %4633 = vmatmul.mubr.bf16.vlgmr.msra.gmra.mrb[4].mxu0 %v7103_v19  ;;  %4838 = vmatmul.mubr.bf16.vlgmr.msra.gmra.mrb[4].mxu1 %v7103_v19 }
 0x208   :  { %4642 = vmatpush1.bf16.msra.mxu0 %v6728_v35  ;;  %4847 = vmatpush1.bf16.msra.mxu1 %v6731_v20  ;;  %v6805_v35 = vld [vmem:[#allocation5 + $0x10fc] ss:$36 sps:$4 sm:$0xff]   ;;  %v6800_v20 = vld [vmem:[#allocation5 + $0x10f0] ss:$36 sps:$4 sm:$0xff]  }
 0x209   :  { %4643 = vmatprep.subr.bf16.mxu0 %v6736_v36  ;;  %4848 = vmatprep.subr.bf16.mxu1 %v6739_v38  ;;  %v6803_v36 = vld [vmem:[#allocation5 + $0x10f8] ss:$36 sps:$4 sm:$0xff]  }
 0x20a   :  { %4673 = vmatprep.mubr.bf16.mxu0 %v7109_v24  ;;  %4878 = vmatprep.mubr.bf16.mxu1 %v7109_v24  ;;  %v6808_v38 = vld [vmem:[#allocation5 + $0x113c] ss:$36 sps:$4 sm:$0xff]  }
 0x20c   :  { %4644 = vmatpush1.bf16.msra.mxu0 %v6734_v39  ;;  %4849 = vmatpush1.bf16.msra.mxu1 %v6737_v40  ;;  %v6811_v39 = vld [vmem:[#allocation5 + $0x1144] ss:$36 sps:$4 sm:$0xff]   ;;  %v6806_v40 = vld [vmem:[#allocation5 + $0x1138] ss:$36 sps:$4 sm:$0xff]  }
 0x20d   :  { %4645 = vmatprep.subr.bf16.mxu0 %v6742_v41  ;;  %4850 = vmatprep.subr.bf16.mxu1 %v6745_v42  ;;  %v6809_v41 = vld [vmem:[#allocation5 + $0x1140] ss:$36 sps:$4 sm:$0xff]  }
 0x20e   :  { %v6814_v42 = vld [vmem:[#allocation5 + $0x1184] ss:$36 sps:$4 sm:$0xff]  }
 0x210   :  { %4646 = vmatpush1.bf16.msra.mxu0 %v6740_v43  ;;  %4851 = vmatpush1.bf16.msra.mxu1 %v6743_v44  ;;  %v6817_v43 = vld [vmem:[#allocation5 + $0x118c] ss:$36 sps:$4 sm:$0xff]   ;;  %v6812_v44 = vld [vmem:[#allocation5 + $0x1180] ss:$36 sps:$4 sm:$0xff]  }
 0x211   :  { %4647 = vmatprep.subr.bf16.mxu0 %v6748_v45  ;;  %4852 = vmatprep.subr.bf16.mxu1 %v6751_v46  ;;  %v6815_v45 = vld [vmem:[#allocation5 + $0x1188] ss:$36 sps:$4 sm:$0xff]  }
 0x212   :  { %v6820_v46 = vld [vmem:[#allocation5 + $0x11cc] ss:$36 sps:$4 sm:$0xff]  }
 0x214   :  { %4648 = vmatpush1.bf16.msra.mxu0 %v6746_v47  ;;  %4853 = vmatpush1.bf16.msra.mxu1 %v6749_v49  ;;  %v6823_v47 = vld [vmem:[#allocation5 + $0x11d4] ss:$36 sps:$4 sm:$0xff]   ;;  %v6818_v49 = vld [vmem:[#allocation5 + $0x11c8] ss:$36 sps:$4 sm:$0xff]  }
 0x215   :  { %4649 = vmatprep.subr.bf16.mxu0 %v6754_v50  ;;  %4854 = vmatprep.subr.bf16.mxu1 %v6757_v51  ;;  %v6821_v50 = vld [vmem:[#allocation5 + $0x11d0] ss:$36 sps:$4 sm:$0xff]  }
 0x216   :  { %v6826_v51 = vld [vmem:[#allocation5 + $0x1214] ss:$36 sps:$4 sm:$0xff]  }
 0x218   :  { %4650 = vmatpush1.bf16.msra.mxu0 %v6752_v52  ;;  %4855 = vmatpush1.bf16.msra.mxu1 %v6755_v53  ;;  %v6829_v52 = vld [vmem:[#allocation5 + $0x121c] ss:$36 sps:$4 sm:$0xff]   ;;  %v6824_v53 = vld [vmem:[#allocation5 + $0x1210] ss:$36 sps:$4 sm:$0xff]  }
 0x219   :  { %4651 = vmatprep.subr.bf16.mxu0 %v6760_v54  ;;  %4856 = vmatprep.subr.bf16.mxu1 %v6763_v55  ;;  %v6827_v54 = vld [vmem:[#allocation5 + $0x1218] ss:$36 sps:$4 sm:$0xff]  }
 0x21a   :  { %v4306_v60 = vpop.f32.mrb[0].mxu0  ;;  %v4511_v61 = vpop.f32.mrb[0].mxu1  ;;  %v6832_v55 = vld [vmem:[#allocation5 + $0x125c] ss:$36 sps:$4 sm:$0xff]  }
 0x21b   :  { %5128 = vst [vmem:[#allocation7] sm:$0xff] %v4306_v60  ;;  %5130 = vst [vmem:[#allocation7 + $0x10] sm:$0xff] %v4511_v61  ;;  %v4308_v62 = vpop.f32.mrb[1].mxu0  ;;  %v4513_v63 = vpop.f32.mrb[1].mxu1  ;;  %v6841_v60 = vld [vmem:[#allocation5 + $0x12ac] ss:$36 sps:$4 sm:$0xff]  }
 0x21c   :  { %5129 = vst [vmem:[#allocation7 + $0x8] sm:$0xff] %v4308_v62  ;;  %5131 = vst [vmem:[#allocation7 + $0x18] sm:$0xff] %v4513_v63  ;;  %v4310_v0 = vpop.f32.mrb[2].mxu0  ;;  %v4515_v1 = vpop.f32.mrb[2].mxu1  ;;  %4652 = vmatpush1.bf16.msra.mxu0 %v6758_v56  ;;  %4857 = vmatpush1.bf16.msra.mxu1 %v6761_v57  ;;  %v6835_v56 = vld [vmem:[#allocation5 + $0x1264] ss:$36 sps:$4 sm:$0xff]  }
 0x21d   :  { %v4311_v4 = vpop.f32.mrb[3].mxu0  ;;  %v4516_v6 = vpop.f32.mrb[3].mxu1  ;;  %4653 = vmatprep.subr.bf16.mxu0 %v6766_v58  ;;  %4858 = vmatprep.subr.bf16.mxu1 %v6769_v59  ;;  %v6830_v57 = vld [vmem:[#allocation5 + $0x1258] ss:$36 sps:$4 sm:$0xff]   ;;  %v6833_v58 = vld [vmem:[#allocation5 + $0x1260] ss:$36 sps:$4 sm:$0xff]  }
 0x21e   :  { %v6838_v59 = vld [vmem:[#allocation5 + $0x12a4] ss:$36 sps:$4 sm:$0xff]   ;;  %v6844_v63 = vld [vmem:[#allocation5 + $0x12ec] ss:$36 sps:$4 sm:$0xff]   ;;  %v6847_v0 = vld [vmem:[#allocation5 + $0x12f4] ss:$36 sps:$4 sm:$0xff]  }
 0x21f   :  { %v6836_v61 = vld [vmem:[#allocation5 + $0x12a0] ss:$36 sps:$4 sm:$0xff]   ;;  %v6839_v62 = vld [vmem:[#allocation5 + $0x12a8] ss:$36 sps:$4 sm:$0xff]   ;;  %v6848_v6 = vld [vmem:[#allocation5 + $0x1330] ss:$36 sps:$4 sm:$0xff]  }
 0x220   :  { %4654 = vmatpush1.bf16.msra.mxu0 %v6764_v2  ;;  %4859 = vmatpush1.bf16.msra.mxu1 %v6767_v3  ;;  %v6842_v1 = vld [vmem:[#allocation5 + $0x12e8] ss:$36 sps:$4 sm:$0xff]   ;;  %v6845_v2 = vld [vmem:[#allocation5 + $0x12f0] ss:$36 sps:$4 sm:$0xff]   ;;  %v6853_v4 = vld [vmem:[#allocation5 + $0x133c] ss:$36 sps:$4 sm:$0xff]  }
 0x221   :  { %4655 = vmatprep.subr.bf16.mxu0 %v6772_v7  ;;  %4860 = vmatprep.subr.bf16.mxu1 %v6775_v8  ;;  %v6850_v3 = vld [vmem:[#allocation5 + $0x1334] ss:$36 sps:$4 sm:$0xff]   ;;  %v6856_v7 = vld [vmem:[#allocation5 + $0x137c] ss:$36 sps:$4 sm:$0xff]   ;;  %v6859_v8 = vld [vmem:[#allocation5 + $0x1384] ss:$36 sps:$4 sm:$0xff]  }
 0x224   :  { %4656 = vmatpush1.bf16.msra.mxu0 %v6770_v9  ;;  %4861 = vmatpush1.bf16.msra.mxu1 %v6773_v11  ;;  %v6854_v9 = vld [vmem:[#allocation5 + $0x1378] ss:$36 sps:$4 sm:$0xff]   ;;  %v6857_v11 = vld [vmem:[#allocation5 + $0x1380] ss:$36 sps:$4 sm:$0xff]  }
 0x225   :  { %4657 = vmatprep.subr.bf16.mxu0 %v6778_v12  ;;  %4862 = vmatprep.subr.bf16.mxu1 %v6781_v14  ;;  %v6862_v12 = vld [vmem:[#allocation5 + $0x13c4] ss:$36 sps:$4 sm:$0xff]   ;;  %v6865_v14 = vld [vmem:[#allocation5 + $0x13cc] ss:$36 sps:$4 sm:$0xff]  }
 0x228   :  { %4658 = vmatpush1.bf16.msra.mxu0 %v6776_v16  ;;  %4863 = vmatpush1.bf16.msra.mxu1 %v6779_v17  ;;  %v6860_v16 = vld [vmem:[#allocation5 + $0x13c0] ss:$36 sps:$4 sm:$0xff]   ;;  %v6863_v17 = vld [vmem:[#allocation5 + $0x13c8] ss:$36 sps:$4 sm:$0xff]  }
 0x229   :  { %4659 = vmatprep.subr.bf16.mxu0 %v6784_v18  ;;  %4864 = vmatprep.subr.bf16.mxu1 %v6787_v21  ;;  %v6868_v18 = vld [vmem:[#allocation5 + $0x140c] ss:$36 sps:$4 sm:$0xff]   ;;  %v6871_v21 = vld [vmem:[#allocation5 + $0x1414] ss:$36 sps:$4 sm:$0xff]  }
 0x22c   :  { %4660 = vmatpush1.bf16.msra.mxu0 %v6782_v22  ;;  %4865 = vmatpush1.bf16.msra.mxu1 %v6785_v23  ;;  %v6866_v22 = vld [vmem:[#allocation5 + $0x1408] ss:$36 sps:$4 sm:$0xff]   ;;  %v6869_v23 = vld [vmem:[#allocation5 + $0x1410] ss:$36 sps:$4 sm:$0xff]  }
 0x22d   :  { %4661 = vmatprep.subr.bf16.mxu0 %v6790_v13  ;;  %4866 = vmatprep.subr.bf16.mxu1 %v6793_v25  ;;  %v6872_v13 = vld [vmem:[#allocation5 + $0x260] ss:$36 sps:$4 sm:$0xff]  }
 0x22e   :  { %v6873_v25 = vld [vmem:[#allocation5 + $0x6e0] ss:$36 sps:$4 sm:$0xff]  }
 0x230   :  { %4662 = vmatpush1.bf16.msra.mxu0 %v6788_v26  ;;  %4867 = vmatpush1.bf16.msra.mxu1 %v6791_v27  ;;  %v6874_v26 = vld [vmem:[#allocation5 + $0x20] ss:$36 sps:$4 sm:$0xff]  }
 0x231   :  { %4663 = vmatprep.subr.bf16.mxu0 %v6796_v29  ;;  %4868 = vmatprep.subr.bf16.mxu1 %v6799_v31  ;;  %v6875_v27 = vld [vmem:[#allocation5 + $0x4a0] ss:$36 sps:$4 sm:$0xff]   ;;  %v6876_v29 = vld [vmem:[#allocation5 + $0x2a8] ss:$36 sps:$4 sm:$0xff]  }
 0x232   :  { %v6877_v31 = vld [vmem:[#allocation5 + $0x728] ss:$36 sps:$4 sm:$0xff]  }
 0x234   :  { %4664 = vmatpush1.bf16.msra.mxu0 %v6794_v32  ;;  %4869 = vmatpush1.bf16.msra.mxu1 %v6797_v33  ;;  %v7141_v32 = vld [vmem:[#allocation2 + $0x20] ss:$0 sps:$4 sm:$0xff]   ;;  %v6878_v33 = vld [vmem:[#allocation5 + $0x68] ss:$36 sps:$4 sm:$0xff]  }
 0x235   :  { %4665 = vmatprep.subr.bf16.mxu0 %v6802_v34  ;;  %4870 = vmatprep.subr.bf16.mxu1 %v6805_v35  ;;  %v6879_v34 = vld [vmem:[#allocation5 + $0x4e8] ss:$36 sps:$4 sm:$0xff]   ;;  %v6880_v35 = vld [vmem:[#allocation5 + $0x2f0] ss:$36 sps:$4 sm:$0xff]  }
 0x238   :  { %4666 = vmatpush1.bf16.msra.mxu0 %v6800_v20  ;;  %4871 = vmatpush1.bf16.msra.mxu1 %v6803_v36  ;;  %v6881_v20 = vld [vmem:[#allocation5 + $0x770] ss:$36 sps:$4 sm:$0xff]  }
 0x239   :  { %4667 = vmatprep.subr.bf16.mxu0 %v6808_v38  ;;  %4872 = vmatprep.subr.bf16.mxu1 %v6811_v39  ;;  %v6882_v36 = vld [vmem:[#allocation5 + $0xb0] ss:$36 sps:$4 sm:$0xff]   ;;  %v6884_v39 = vld [vmem:[#allocation5 + $0x338] ss:$36 sps:$4 sm:$0xff]  }
 0x23a   :  { %v6883_v38 = vld [vmem:[#allocation5 + $0x530] ss:$36 sps:$4 sm:$0xff]  }
 0x23c   :  { %4668 = vmatpush1.bf16.msra.mxu0 %v6806_v40  ;;  %4873 = vmatpush1.bf16.msra.mxu1 %v6809_v41  ;;  %v6885_v40 = vld [vmem:[#allocation5 + $0x7b8] ss:$36 sps:$4 sm:$0xff]  }
 0x23d   :  { %4669 = vmatprep.subr.bf16.mxu0 %v6814_v42  ;;  %4874 = vmatprep.subr.bf16.mxu1 %v6817_v43  ;;  %v6886_v41 = vld [vmem:[#allocation5 + $0xf8] ss:$36 sps:$4 sm:$0xff]   ;;  %v6888_v43 = vld [vmem:[#allocation5 + $0x380] ss:$36 sps:$4 sm:$0xff]  }
 0x23e   :  { %v6887_v42 = vld [vmem:[#allocation5 + $0x578] ss:$36 sps:$4 sm:$0xff]  }
 0x240   :  { %4670 = vmatpush1.bf16.msra.mxu0 %v6812_v44  ;;  %4875 = vmatpush1.bf16.msra.mxu1 %v6815_v45  ;;  %v6889_v44 = vld [vmem:[#allocation5 + $0x800] ss:$36 sps:$4 sm:$0xff]   ;;  %v6892_v45 = vld [vmem:[#allocation5 + $0x3c8] ss:$36 sps:$4 sm:$0xff]  }
 0x241   :  { %4671 = vmatprep.subr.bf16.mxu0 %v6820_v46  ;;  %4876 = vmatprep.subr.bf16.mxu1 %v6823_v47  ;;  %v6893_v46 = vld [vmem:[#allocation5 + $0x848] ss:$36 sps:$4 sm:$0xff]  }
 0x242   :  { %v6894_v47 = vld [vmem:[#allocation5 + $0x188] ss:$36 sps:$4 sm:$0xff]  }
 0x244   :  { %4672 = vmatpush1.bf16.msra.mxu0 %v6818_v49  ;;  %4877 = vmatpush1.bf16.msra.mxu1 %v6821_v50  ;;  %v6895_v49 = vld [vmem:[#allocation5 + $0x608] ss:$36 sps:$4 sm:$0xff]   ;;  %v6896_v50 = vld [vmem:[#allocation5 + $0x410] ss:$36 sps:$4 sm:$0xff]  }
 0x245   :  { %4682 = vmatprep.subr.bf16.mxu0 %v6826_v51  ;;  %4887 = vmatprep.subr.bf16.mxu1 %v6829_v52  ;;  %v6897_v51 = vld [vmem:[#allocation5 + $0x890] ss:$36 sps:$4 sm:$0xff]  }
 0x246   :  { %v6898_v52 = vld [vmem:[#allocation5 + $0x1d0] ss:$36 sps:$4 sm:$0xff]  }
 0x247   :  { %4674 = vmatmul.mubr.bf16.vlgmr.msra.gmra.mrb[4].mxu0 %v7117_v28  ;;  %4879 = vmatmul.mubr.bf16.vlgmr.msra.gmra.mrb[4].mxu1 %v7117_v28 }
 0x248   :  { %4683 = vmatpush1.bf16.msra.mxu0 %v6824_v53  ;;  %4888 = vmatpush1.bf16.msra.mxu1 %v6827_v54  ;;  %v6899_v53 = vld [vmem:[#allocation5 + $0x650] ss:$36 sps:$4 sm:$0xff]   ;;  %v6900_v54 = vld [vmem:[#allocation5 + $0x458] ss:$36 sps:$4 sm:$0xff]  }
 0x249   :  { %4684 = vmatprep.subr.bf16.mxu0 %v6832_v55  ;;  %4889 = vmatprep.subr.bf16.mxu1 %v6835_v56  ;;  %v6901_v55 = vld [vmem:[#allocation5 + $0x8d8] ss:$36 sps:$4 sm:$0xff]  }
 0x24a   :  { %4714 = vmatprep.mubr.bf16.mxu0 %v7021_v37  ;;  %4919 = vmatprep.mubr.bf16.mxu1 %v7021_v37  ;;  %v6851_v37 = vld [vmem:[#allocation5 + $0x1338] ss:$36 sps:$4 sm:$0xff]  }
 0x24b   :  { %v6902_v56 = vld [vmem:[#allocation5 + $0x218] ss:$36 sps:$4 sm:$0xff]  }
 0x24c   :  { %4685 = vmatpush1.bf16.msra.mxu0 %v6830_v57  ;;  %4890 = vmatpush1.bf16.msra.mxu1 %v6833_v58  ;;  %v6903_v57 = vld [vmem:[#allocation5 + $0x698] ss:$36 sps:$4 sm:$0xff]   ;;  %v6904_v58 = vld [vmem:[#allocation5 + $0xb60] ss:$36 sps:$4 sm:$0xff]  }
 0x24d   :  { %4686 = vmatprep.subr.bf16.mxu0 %v6838_v59  ;;  %4891 = vmatprep.subr.bf16.mxu1 %v6841_v60  ;;  %v6906_v59 = vld [vmem:[#allocation5 + $0xfe0] ss:$36 sps:$4 sm:$0xff]  }
 0x24e   :  { %v6905_v60 = vld [vmem:[#allocation5 + $0x920] ss:$36 sps:$4 sm:$0xff]  }
 0x250   :  { %4687 = vmatpush1.bf16.msra.mxu0 %v6836_v61  ;;  %4892 = vmatpush1.bf16.msra.mxu1 %v6839_v62  ;;  %v6907_v61 = vld [vmem:[#allocation5 + $0xda0] ss:$36 sps:$4 sm:$0xff]   ;;  %v6908_v62 = vld [vmem:[#allocation5 + $0xba8] ss:$36 sps:$4 sm:$0xff]  }
 0x251   :  { %4688 = vmatprep.subr.bf16.mxu0 %v6844_v63  ;;  %4893 = vmatprep.subr.bf16.mxu1 %v6847_v0  ;;  %v6910_v63 = vld [vmem:[#allocation5 + $0x1028] ss:$36 sps:$4 sm:$0xff]  }
 0x252   :  { %v6909_v0 = vld [vmem:[#allocation5 + $0x968] ss:$36 sps:$4 sm:$0xff]  }
 0x254   :  { %4689 = vmatpush1.bf16.msra.mxu0 %v6842_v1  ;;  %4894 = vmatpush1.bf16.msra.mxu1 %v6845_v2  ;;  %v6911_v1 = vld [vmem:[#allocation5 + $0xde8] ss:$36 sps:$4 sm:$0xff]   ;;  %v6912_v2 = vld [vmem:[#allocation5 + $0xbf0] ss:$36 sps:$4 sm:$0xff]  }
 0x255   :  { %4690 = vmatprep.subr.bf16.mxu0 %v6850_v3  ;;  %4895 = vmatprep.subr.bf16.mxu1 %v6853_v4  ;;  %v6914_v3 = vld [vmem:[#allocation5 + $0x1070] ss:$36 sps:$4 sm:$0xff]  }
 0x256   :  { %v6913_v4 = vld [vmem:[#allocation5 + $0x9b0] ss:$36 sps:$4 sm:$0xff]  }
 0x258   :  { %4691 = vmatpush1.bf16.msra.mxu0 %v6848_v6  ;;  %4896 = vmatpush1.bf16.msra.mxu1 %v6851_v37  ;;  %v6915_v6 = vld [vmem:[#allocation5 + $0xe30] ss:$36 sps:$4 sm:$0xff]   ;;  %v6917_v37 = vld [vmem:[#allocation5 + $0x9f8] ss:$36 sps:$4 sm:$0xff]  }
 0x259   :  { %4692 = vmatprep.subr.bf16.mxu0 %v6856_v7  ;;  %4897 = vmatprep.subr.bf16.mxu1 %v6859_v8  ;;  %v6919_v7 = vld [vmem:[#allocation5 + $0xe78] ss:$36 sps:$4 sm:$0xff]   ;;  %v6920_v8 = vld [vmem:[#allocation5 + $0xc80] ss:$36 sps:$4 sm:$0xff]  }
 0x25c   :  { %4693 = vmatpush1.bf16.msra.mxu0 %v6854_v9  ;;  %4898 = vmatpush1.bf16.msra.mxu1 %v6857_v11  ;;  %v6922_v9 = vld [vmem:[#allocation5 + $0x1100] ss:$36 sps:$4 sm:$0xff]   ;;  %v6924_v11 = vld [vmem:[#allocation5 + $0xcc8] ss:$36 sps:$4 sm:$0xff]  }
 0x25d   :  { %4694 = vmatprep.subr.bf16.mxu0 %v6862_v12  ;;  %4899 = vmatprep.subr.bf16.mxu1 %v6865_v14  ;;  %v6926_v12 = vld [vmem:[#allocation5 + $0x1148] ss:$36 sps:$4 sm:$0xff]  }
 0x25e   :  { %v6925_v14 = vld [vmem:[#allocation5 + $0xa88] ss:$36 sps:$4 sm:$0xff]  }
 0x260   :  { %4695 = vmatpush1.bf16.msra.mxu0 %v6860_v16  ;;  %4900 = vmatpush1.bf16.msra.mxu1 %v6863_v17  ;;  %v6927_v16 = vld [vmem:[#allocation5 + $0xf08] ss:$36 sps:$4 sm:$0xff]   ;;  %v6928_v17 = vld [vmem:[#allocation5 + $0xd10] ss:$36 sps:$4 sm:$0xff]  }
 0x261   :  { %4696 = vmatprep.subr.bf16.mxu0 %v6868_v18  ;;  %4901 = vmatprep.subr.bf16.mxu1 %v6871_v21  ;;  %v6930_v18 = vld [vmem:[#allocation5 + $0x1190] ss:$36 sps:$4 sm:$0xff]  }
 0x262   :  { %v6929_v21 = vld [vmem:[#allocation5 + $0xad0] ss:$36 sps:$4 sm:$0xff]  }
 0x264   :  { %4697 = vmatpush1.bf16.msra.mxu0 %v6866_v22  ;;  %4902 = vmatpush1.bf16.msra.mxu1 %v6869_v23  ;;  %v6931_v22 = vld [vmem:[#allocation5 + $0xf50] ss:$36 sps:$4 sm:$0xff]   ;;  %v6932_v23 = vld [vmem:[#allocation5 + $0xd58] ss:$36 sps:$4 sm:$0xff]  }
 0x265   :  { %5810 = vmatprep.subr.bf16.mxu0 %v6872_v13  ;;  %5832 = vmatprep.subr.bf16.mxu1 %v6873_v25  ;;  %v6934_v13 = vld [vmem:[#allocation5 + $0x11d8] ss:$36 sps:$4 sm:$0xff]  }
 0x266   :  { %v6933_v25 = vld [vmem:[#allocation5 + $0xb18] ss:$36 sps:$4 sm:$0xff]  }
 0x267   :  { %4715 = vmatmul.mubr.bf16.vlgmr.msra.gmra.mrb[4].mxu0 %v7141_v32  ;;  %4920 = vmatmul.mubr.bf16.vlgmr.msra.gmra.mrb[4].mxu1 %v7141_v32 }
 0x268   :  { %5811 = vmatpush3.bf16.msra.mxu0 %v6874_v26  ;;  %5833 = vmatpush3.bf16.msra.mxu1 %v6875_v27  ;;  %v6935_v26 = vld [vmem:[#allocation5 + $0xf98] ss:$36 sps:$4 sm:$0xff]   ;;  %v6936_v27 = vld [vmem:[#allocation5 + $0x1220] ss:$36 sps:$4 sm:$0xff]  }
 0x269   :  { %5812 = vmatprep.subr.bf16.mxu0 %v6876_v29  ;;  %5834 = vmatprep.subr.bf16.mxu1 %v6877_v31  ;;  %v7022_v29 = vmov 0.0   ;;  %v6937_v31 = vld [vmem:[#allocation5 + $0x1268] ss:$36 sps:$4 sm:$0xff]  }
 0x26a   :  { %4960 = vmatprep.mubr.bf16.mxu0 %v7071_v48  ;;  %5000 = vmatprep.mubr.bf16.mxu1 %v7083_v30  ;;  %v6890_v48 = vld [vmem:[#allocation5 + $0x140] ss:$36 sps:$4 sm:$0xff]  }
 0x26b   :  { %v6891_v30 = vld [vmem:[#allocation5 + $0x5c0] ss:$36 sps:$4 sm:$0xff]  }
 0x26c   :  { %5813 = vmatpush3.bf16.msra.mxu0 %v6878_v33  ;;  %5835 = vmatpush3.bf16.msra.mxu1 %v6879_v34  ;;  %v6938_v33 = vld [vmem:[#allocation5 + $0x12b0] ss:$36 sps:$4 sm:$0xff]   ;;  %v6939_v34 = vld [vmem:[#allocation5 + $0x12f8] ss:$36 sps:$4 sm:$0xff]  }
 0x26d   :  { %5814 = vmatprep.subr.bf16.mxu0 %v6880_v35  ;;  %5836 = vmatprep.subr.bf16.mxu1 %v6881_v20  ;;  %v6940_v35 = vld [vmem:[#allocation5 + $0x1340] ss:$36 sps:$4 sm:$0xff]   ;;  %v6941_v20 = vld [vmem:[#allocation5 + $0x1388] ss:$36 sps:$4 sm:$0xff]  }
 0x270   :  { %5815 = vmatpush3.bf16.msra.mxu0 %v6882_v36  ;;  %5837 = vmatpush3.bf16.msra.mxu1 %v6883_v38 }
 0x271   :  { %5816 = vmatprep.subr.bf16.mxu0 %v6884_v39  ;;  %5838 = vmatprep.subr.bf16.mxu1 %v6885_v40 }
 0x274   :  { %5817 = vmatpush3.bf16.msra.mxu0 %v6886_v41  ;;  %5839 = vmatpush3.bf16.msra.mxu1 %v6887_v42 }
 0x275   :  { %5818 = vmatprep.subr.bf16.mxu0 %v6888_v43  ;;  %5840 = vmatprep.subr.bf16.mxu1 %v6889_v44 }
 0x278   :  { %5819 = vmatpush3.bf16.msra.mxu0 %v6890_v48  ;;  %5841 = vmatpush3.bf16.msra.mxu1 %v6891_v30 }
 0x279   :  { %5820 = vmatprep.subr.bf16.mxu0 %v6892_v45  ;;  %5842 = vmatprep.subr.bf16.mxu1 %v6893_v46 }
 0x27c   :  { %5821 = vmatpush3.bf16.msra.mxu0 %v6894_v47  ;;  %5843 = vmatpush3.bf16.msra.mxu1 %v6895_v49 }
 0x27d   :  { %5822 = vmatprep.subr.bf16.mxu0 %v6896_v50  ;;  %5844 = vmatprep.subr.bf16.mxu1 %v6897_v51 }
 0x280   :  { %5823 = vmatpush3.bf16.msra.mxu0 %v6898_v52  ;;  %5845 = vmatpush3.bf16.msra.mxu1 %v6899_v53 }
 0x281   :  { %5824 = vmatprep.subr.bf16.mxu0 %v6900_v54  ;;  %5846 = vmatprep.subr.bf16.mxu1 %v6901_v55 }
 0x284   :  { %5825 = vmatpush3.bf16.msra.mxu0 %v6902_v56  ;;  %5847 = vmatpush3.bf16.msra.mxu1 %v6903_v57 }
 0x285   :  { %5854 = vmatprep.subr.bf16.mxu0 %v6904_v58  ;;  %5876 = vmatprep.subr.bf16.mxu1 %v6906_v59 }
 0x287   :  { %4961 = vmatmul.mubr.bf16.vlgmr.msra.gmra.mrb[8].mxu0 %v7075_v5  ;;  %5001 = vmatmul.mubr.bf16.vlgmr.msra.gmra.mrb[8].mxu1 %v7089_v10  ;;  %v6916_v5 = vld [vmem:[#allocation5 + $0xc38] ss:$36 sps:$4 sm:$0xff]  }
 0x288   :  { %5855 = vmatpush3.bf16.msra.mxu0 %v6905_v60  ;;  %5877 = vmatpush3.bf16.msra.mxu1 %v6907_v61  ;;  %v6918_v10 = vld [vmem:[#allocation5 + $0x10b8] ss:$36 sps:$4 sm:$0xff]  }
 0x289   :  { %5856 = vmatprep.subr.bf16.mxu0 %v6908_v62  ;;  %5878 = vmatprep.subr.bf16.mxu1 %v6910_v63 }
 0x28a   :  { %5040 = vmatprep.mubr.bf16.mxu0 %v7095_v15  ;;  %5080 = vmatprep.mubr.bf16.mxu1 %v7109_v24  ;;  %v6921_v15 = vld [vmem:[#allocation5 + $0xa40] ss:$36 sps:$4 sm:$0xff]  }
 0x28b   :  { %v6923_v24 = vld [vmem:[#allocation5 + $0xec0] ss:$36 sps:$4 sm:$0xff]  }
 0x28c   :  { %5857 = vmatpush3.bf16.msra.mxu0 %v6909_v0  ;;  %5879 = vmatpush3.bf16.msra.mxu1 %v6911_v1 }
 0x28d   :  { %5858 = vmatprep.subr.bf16.mxu0 %v6912_v2  ;;  %5880 = vmatprep.subr.bf16.mxu1 %v6914_v3 }
 0x290   :  { %5859 = vmatpush3.bf16.msra.mxu0 %v6913_v4  ;;  %5881 = vmatpush3.bf16.msra.mxu1 %v6915_v6 }
 0x291   :  { %5860 = vmatprep.subr.bf16.mxu0 %v6916_v5  ;;  %5882 = vmatprep.subr.bf16.mxu1 %v6918_v10 }
 0x294   :  { %5861 = vmatpush3.bf16.msra.mxu0 %v6917_v37  ;;  %5883 = vmatpush3.bf16.msra.mxu1 %v6919_v7 }
 0x295   :  { %5862 = vmatprep.subr.bf16.mxu0 %v6920_v8  ;;  %5884 = vmatprep.subr.bf16.mxu1 %v6922_v9 }
 0x298   :  { %5863 = vmatpush3.bf16.msra.mxu0 %v6921_v15  ;;  %5885 = vmatpush3.bf16.msra.mxu1 %v6923_v24 }
 0x299   :  { %5864 = vmatprep.subr.bf16.mxu0 %v6924_v11  ;;  %5886 = vmatprep.subr.bf16.mxu1 %v6926_v12 }
 0x29c   :  { %5865 = vmatpush3.bf16.msra.mxu0 %v6925_v14  ;;  %5887 = vmatpush3.bf16.msra.mxu1 %v6927_v16 }
 0x29d   :  { %5866 = vmatprep.subr.bf16.mxu0 %v6928_v17  ;;  %5888 = vmatprep.subr.bf16.mxu1 %v6930_v18 }
 0x2a0   :  { %5867 = vmatpush3.bf16.msra.mxu0 %v6929_v21  ;;  %5889 = vmatpush3.bf16.msra.mxu1 %v6931_v22 }
 0x2a1   :  { %5868 = vmatprep.subr.bf16.mxu0 %v6932_v23  ;;  %5890 = vmatprep.subr.bf16.mxu1 %v6934_v13 }
 0x2a4   :  { %5869 = vmatpush3.bf16.msra.mxu0 %v6933_v25  ;;  %5891 = vmatpush3.bf16.msra.mxu1 %v6935_v26 }
 0x2a5   :  { %5907 = vmatprep.subr.bf16.mxu0 %v7022_v29 }
 0x2a7   :  { %5041 = vmatmul.mubr.bf16.vlgmr.msra.gmra.mrb[12].mxu0 %v7103_v19  ;;  %5081 = vmatmul.mubr.bf16.vlgmr.msra.gmra.mrb[12].mxu1 %v7117_v28  ;;  %v6942_v19 = vld [vmem:[#allocation5 + $0x13d0] ss:$36 sps:$4 sm:$0xff]   ;;  %v6943_v28 = vld [vmem:[#allocation5 + $0x1418] ss:$36 sps:$4 sm:$0xff]  }
 0x2a8   :  { %5908 = vmatpush3.bf16.msra.mxu0 %v6936_v27  ;;  %5923 = vmatprep.mubr.msk.bf16.mxu0 %vm7023_vm0, %v7022_v29 }
 0x2a9   :  { %5909 = vmatprep.subr.bf16.mxu0 %v7022_v29 }
 0x2ac   :  { %5910 = vmatpush3.bf16.msra.mxu0 %v6937_v31 }
 0x2ad   :  { %5911 = vmatprep.subr.bf16.mxu0 %v7022_v29 }
 0x2b0   :  { %5912 = vmatpush3.bf16.msra.mxu0 %v6938_v33 }
 0x2b1   :  { %5913 = vmatprep.subr.bf16.mxu0 %v7022_v29 }
 0x2b4   :  { %5914 = vmatpush3.bf16.msra.mxu0 %v6939_v34 }
 0x2b5   :  { %5915 = vmatprep.subr.bf16.mxu0 %v7022_v29 }
 0x2b8   :  { %5916 = vmatpush3.bf16.msra.mxu0 %v6940_v35 }
 0x2b9   :  { %5917 = vmatprep.subr.bf16.mxu0 %v7022_v29 }
 0x2bc   :  { %5918 = vmatpush3.bf16.msra.mxu0 %v6941_v20 }
 0x2bd   :  { %5919 = vmatprep.subr.bf16.mxu0 %v7022_v29 }
 0x2c0   :  { %5920 = vmatpush3.bf16.msra.mxu0 %v6942_v19 }
 0x2c1   :  { %5921 = vmatprep.subr.bf16.mxu0 %v7022_v29 }
 0x2c4   :  { %5922 = vmatpush3.bf16.msra.mxu0 %v6943_v28 }
 0x2c7   :  { %5924 = vmatmul.mubr.bf16.vlgmr.msra.gmra.mrb[16].mxu0 %v7141_v32 }
 0x33a   :  { %v4716_v36 = vpop.f32.mrb[4].mxu0  ;;  %v4921_v38 = vpop.f32.mrb[4].mxu1 }
 0x33b   :  { %5132 = vst [vmem:[#allocation7 + $0x20] sm:$0xff] %v4716_v36  ;;  %5134 = vst [vmem:[#allocation7 + $0x30] sm:$0xff] %v4921_v38  ;;  %v4718_v39 = vpop.f32.mrb[5].mxu0  ;;  %v4923_v40 = vpop.f32.mrb[5].mxu1 }
 0x33c   :  { %5133 = vst [vmem:[#allocation7 + $0x28] sm:$0xff] %v4718_v39  ;;  %5135 = vst [vmem:[#allocation7 + $0x38] sm:$0xff] %v4923_v40  ;;  %v4720_v41 = vpop.f32.mrb[6].mxu0  ;;  %v4925_v42 = vpop.f32.mrb[6].mxu1 }
 0x33d   :  { %v4721_v43 = vpop.f32.mrb[7].mxu0  ;;  %v4926_v44 = vpop.f32.mrb[7].mxu1 }
 0x35a   :  { %v5826_v48 = vpop.f32.mrb[8].mxu0  ;;  %v5848_v30 = vpop.f32.mrb[8].mxu1 }
 0x35b   :  { %v5827_v45 = vpop.f32.mrb[9].mxu0  ;;  %v5849_v46 = vpop.f32.mrb[9].mxu1 }
 0x35c   :  { %v5828_v47 = vadd.f32 %v5827_v45, %v5826_v48  ;;  %v5850_v49 = vadd.f32 %v5849_v46, %v5848_v30  ;;  %v5829_v50 = vpop.f32.mrb[10].mxu0  ;;  %v5851_v32 = vpop.f32.mrb[10].mxu1 }
 0x35d   :  { %v5830_v51 = vpop.f32.mrb[11].mxu0  ;;  %v5852_v52 = vpop.f32.mrb[11].mxu1 }
 0x35e   :  { %v5003_v53 = vadd.f32 %v5850_v49, %v5828_v47 }
 0x37a   :  { %v5870_v54 = vpop.f32.mrb[12].mxu0  ;;  %v5892_v55 = vpop.f32.mrb[12].mxu1 }
 0x37b   :  { %v5871_v56 = vpop.f32.mrb[13].mxu0  ;;  %v5893_v57 = vpop.f32.mrb[13].mxu1 }
 0x37c   :  { %v5872_v58 = vadd.f32 %v5871_v56, %v5870_v54  ;;  %v5873_v59 = vpop.f32.mrb[14].mxu0  ;;  %v5894_v60 = vadd.f32 %v5893_v57, %v5892_v55  ;;  %v5895_v61 = vpop.f32.mrb[14].mxu1 }
 0x37d   :  { %v5874_v62 = vpop.f32.mrb[15].mxu0  ;;  %v5896_v63 = vpop.f32.mrb[15].mxu1 }
 0x37e   :  { %v5043_v0 = vadd.f32 %v5872_v58, %v5003_v53 }
 0x380   :  { %v5083_v1 = vadd.f32 %v5894_v60, %v5043_v0 }
 0x39a   :  { %v5122_v2 = vpop.f32.mrb[16].mxu0 }
 0x39b   :  { %v5123_v3 = vadd.f32 %v5122_v2, %v5083_v1  ;;  %v5925_v4 = vpop.f32.mrb[17].mxu0 }
 0x39c   :  { %v5125_v6 = vpop.f32.mrb[18].mxu0 }
 0x39d   :  { %5136 = vst [vmem:[#allocation7 + $0x40] sm:$0xff] %v5123_v3  ;;  %v5926_v5 = vpop.f32.mrb[19].mxu0 }
 0x39e   :  { %7000 = shalt.err (!%p6997_p6)
}
 0x39f   :  { %s7001_s10 = scalar_lea.hbm %s7168_s2, 1152 }
 0x3a0   :  { %p7002_p7 = scmp.ne.s32.totalorder %s7168_s2, %s7001_s10  ;;  %p7005_p8 = scmp.lt.u32.totalorder %s7001_s10, %s7168_s2 }
 0x3a2   :  { %p7007_p9 = pnand %p7005_p8, %p7002_p7 }
 0x3a4   :  { %7010 = shalt.err (!%p7007_p9)
}
 0x3a5   :  { %5146 = dma.vmem_to_hbm [thread:$0]  %s5144_s6, 1152, %s7168_s2, [#allocation4]  }
 0x3a6   :  { %7015 = dma.done.wait [#allocation4], 1152  }
 0x3a7   :  { %7016 = vsyncadd [#allocation4], 4294966144 }
 0x3a8   :  { %5150 = vsyncpa [#allocation3], 1 }
 0x3a9   :  { %5151 = vsyncpa [#allocation6], 1 }
 0x3aa   :  { %5152 = vsyncpa [#allocation4], 1 }

</bundles_post_ra>
